<compile_context>
chip_gen: v6e
topology: v6e:2x2x1
jax: 0.10.0
libtpu: 0.0.40
codegen_flags: <defaults>
</compile_context>

<pallas_src>
import functools

import jax
import jax.numpy as jnp
import numpy as np
from jax.experimental import pallas as pl
from jax.experimental.pallas import tpu as pltpu

BN_EPS = 1e-5


def _make_conv_kernel(C, O, KH, KW, dilation, padding, H, W, H_out, W_out):
    """Fused zero-pad + depthwise + pointwise conv; one batch image per grid step."""
    Hp, Wp = H + 2 * padding, W + 2 * padding
    W_o = W_out

    def kernel(wd_ref, wp_ref, x_ref, y_ref, stats_ref, xpad_ref, yscr_ref):
        # wd_ref   : SMEM (KH*KW*C,)  depthwise weights, index (kh*KW+kw)*C + c
        # wp_ref   : SMEM (C*O,)      pointwise weights, index c*O + o
        # x_ref    : VMEM (1, C, H, W)   unpadded input image tile
        # y_ref    : VMEM (1, O, H_out*W_out)  lane-dense conv output block
        # stats_ref: VMEM (1, O, 2)   per-image (sum, sum-of-squares) BN partials
        # xpad_ref : VMEM (C, Hp, Wp) zero-padded input scratch (pad fused in-kernel)
        # yscr_ref : VMEM (O, H_out, W_out) scratch

        # ---- fused zero-padding: build the padded planes in VMEM (no wrapper HBM pass)
        if padding > 0:
            xpad_ref[...] = jnp.zeros((C, Hp, Wp), jnp.float32)
        xpad_ref[:, padding:padding + H, padding:padding + W] = x_ref[0]

        # ---- depthwise conv (groups == C): per-channel plane, per-tap scalar FMA (VPU)
        accs = []
        for c in range(C):
            xc = xpad_ref[c]                                   # (Hp, Wp)
            a = jnp.zeros((H_out, W_out), jnp.float32)
            for kh in range(KH):
                for kw in range(KW):
                    patch = xc[kh * dilation:kh * dilation + H_out,
                               kw * dilation:kw * dilation + W_out]
                    a = a + patch * wd_ref[(kh * KW + kw) * C + c]
            accs.append(a)

        # ---- pointwise 1x1 conv fused on the VPU (C, O tiny -> MXU would be ~idle)
        for o in range(O):
            plane = accs[0] * wp_ref[o]
            for c in range(1, C):
                plane = plane + accs[c] * wp_ref[c * O + o]
            yscr_ref[o] = plane                                # (H_out, W_out)

        # ---- pack into the lane-dense (O, H_out*W_out) output block (last dim = 256)
        for h in range(H_out):
            y_ref[0, :, h * W_o:(h + 1) * W_o] = yscr_ref[:, h, :]

        # ---- single-pass BN partials (sum, sumsq) for this image, read back dense
        yflat = y_ref[0]                                       # (O, H_out*W_out)
        stats_ref[0, :, 0] = jnp.sum(yflat, axis=1)
        stats_ref[0, :, 1] = jnp.sum(yflat * yflat, axis=1)

    return kernel


def _bn_kernel(y_ref, scale_ref, shift_ref, o_ref):
    # y_ref/o_ref: (1, O, H_out*W_out) lane-dense; scale/shift: (O, 1)
    o_ref[0] = y_ref[0] * scale_ref[...] + shift_ref[...]


@functools.partial(jax.jit, static_argnames=("padding", "dilation"))
def separable_conv2d(x_nchw, w_dw, w_pw, gamma, beta, *, padding, dilation):
    """x_nchw: (N,C,H,W); w_dw: (C,1,KH,KW); w_pw: (O,C,1,1); gamma/beta: (O,)."""
    N, C, H, W = x_nchw.shape
    KH, KW = int(w_dw.shape[2]), int(w_dw.shape[3])
    O = int(w_pw.shape[0])
    H_out = H + 2 * padding - dilation * (KH - 1)
    W_out = W + 2 * padding - dilation * (KW - 1)
    HW = H_out * W_out
    Hp, Wp = H + 2 * padding, W + 2 * padding

    x32 = x_nchw.astype(jnp.float32)

    # Flat scalar weight tables for SMEM (tiny).
    wd_flat = jnp.transpose(w_dw[:, 0, :, :], (1, 2, 0)).reshape(-1).astype(jnp.float32)
    wp_flat = jnp.transpose(w_pw[:, :, 0, 0], (1, 0)).reshape(-1).astype(jnp.float32)

    # Explicit VMEM budget (well under v7x's 64 MiB physical / 32 MiB scoped default,
    # accounting for 2x buffering of each pipelined block); parallel grid -> 2 TCs on v7x.
    cparams = pltpu.CompilerParams(
        dimension_semantics=("parallel",),
        vmem_limit_bytes=32 * 1024 * 1024)

    y_conv, stats = pl.pallas_call(
        _make_conv_kernel(C, O, KH, KW, dilation, padding, H, W, H_out, W_out),
        grid=(N,),
        in_specs=[
            pl.BlockSpec(memory_space=pltpu.MemorySpace.SMEM),          # wd_flat
            pl.BlockSpec(memory_space=pltpu.MemorySpace.SMEM),          # wp_flat
            pl.BlockSpec((1, C, H, W), lambda n: (n, 0, 0, 0)),         # unpadded image
        ],
        out_specs=[
            pl.BlockSpec((1, O, HW), lambda n: (n, 0, 0)),              # conv out (lane-dense)
            pl.BlockSpec((1, O, 2), lambda n: (n, 0, 0)),               # BN partials
        ],
        out_shape=[
            jax.ShapeDtypeStruct((N, O, HW), jnp.float32),
            jax.ShapeDtypeStruct((N, O, 2), jnp.float32),
        ],
        scratch_shapes=[
            pltpu.VMEM((C, Hp, Wp), jnp.float32),    # padded-input scratch
            pltpu.VMEM((O, H_out, W_out), jnp.float32),
        ],
        compiler_params=cparams,
    )(wd_flat, wp_flat, x32)

    # Global (training-mode) BN statistics from per-image partials: tiny (O,2) work.
    tot = jnp.sum(stats, axis=0)                     # (O, 2)
    cnt = jnp.float32(N * H_out * W_out)
    mean = tot[:, 0] / cnt
    # Single-pass E[x^2]-E[x]^2 variance, kept in f32.
    var = jnp.maximum(tot[:, 1] / cnt - mean * mean, 0.0)
    inv = jax.lax.rsqrt(var + BN_EPS)
    g32 = gamma.astype(jnp.float32)
    scale = (g32 * inv).reshape(O, 1)
    shift = (beta.astype(jnp.float32) - mean * g32 * inv).reshape(O, 1)

    # Apply BN in place on the conv buffer (input_output_aliases -> no extra allocation).
    out_flat = pl.pallas_call(
        _bn_kernel,
        grid=(N,),
        in_specs=[
            pl.BlockSpec((1, O, HW), lambda n: (n, 0, 0)),
            pl.BlockSpec((O, 1), lambda n: (0, 0)),
            pl.BlockSpec((O, 1), lambda n: (0, 0)),
        ],
        out_specs=pl.BlockSpec((1, O, HW), lambda n: (n, 0, 0)),
        out_shape=jax.ShapeDtypeStruct((N, O, HW), jnp.float32),
        input_output_aliases={0: 0},
        compiler_params=cparams,
    )(y_conv, scale, shift)

    # (N, O, HW) -> (N, O, H_out, W_out): contiguous, free reshape -> output stays NCHW.
    return out_flat.reshape(N, O, H_out, W_out)


def reference(x, w_dw, w_pw, gamma, beta, *, padding, dilation):
    """Pure-JAX reference matching PyTorch semantics (NCHW, training-mode BN)."""
    dw = jax.lax.conv_general_dilated(
        x, w_dw, window_strides=(1, 1),
        padding=((padding, padding), (padding, padding)),
        rhs_dilation=(dilation, dilation),
        feature_group_count=x.shape[1],
        dimension_numbers=("NCHW", "OIHW", "NCHW"))
    pw = jax.lax.conv_general_dilated(
        dw, w_pw, window_strides=(1, 1), padding="VALID",
        dimension_numbers=("NCHW", "OIHW", "NCHW"))
    mean = pw.mean(axis=(0, 2, 3), keepdims=True)
    var = jnp.square(pw - mean).mean(axis=(0, 2, 3), keepdims=True)
    return (pw - mean) * jax.lax.rsqrt(var + BN_EPS) * gamma.reshape(1, -1, 1, 1) \
        + beta.reshape(1, -1, 1, 1)


if __name__ == "__main__":
    # SeparableConv2d(in_channels=4, out_channels=8, kernel_size=3, padding=2, dilation=2)
    N, C, H, W = 2, 4, 16, 16
    O, K, PAD, DIL = 8, 3, 2, 2

    key = jax.random.PRNGKey(0)
    kx, kd, kp, kg, kb = jax.random.split(key, 5)
    x = jax.random.normal(kx, (N, C, H, W), dtype=jnp.float32)
    w_dw = jax.random.normal(kd, (C, 1, K, K), dtype=jnp.float32) * 0.2   # depthwise (groups=C)
    w_pw = jax.random.normal(kp, (O, C, 1, 1), dtype=jnp.float32) * 0.2   # pointwise 1x1
    gamma = 1.0 + 0.1 * jax.random.normal(kg, (O,), dtype=jnp.float32)     # BN affine
    beta = 0.1 * jax.random.normal(kb, (O,), dtype=jnp.float32)

    out = separable_conv2d(x, w_dw, w_pw, gamma, beta, padding=PAD, dilation=DIL)
    out = jax.block_until_ready(out)

    ref = jax.block_until_ready(
        reference(x, w_dw, w_pw, gamma, beta, padding=PAD, dilation=DIL))
    np.testing.assert_allclose(np.asarray(out), np.asarray(ref), rtol=1e-4, atol=1e-4)

    print("KERNEL_OK")
</pallas_src>

<mosaic_0001>
module attributes {stable_mosaic.version = 11 : i64} {
  func.func @_bn_kernel(%arg0: i32, %arg1: memref<1x8x256xf32, #tpu.memory_space<vmem>>, %arg2: memref<8x1xf32, #tpu.memory_space<vmem>>, %arg3: memref<8x1xf32, #tpu.memory_space<vmem>>, %arg4: memref<1x8x256xf32, #tpu.memory_space<vmem>>) attributes {dimension_semantics = [#tpu.dimension_semantics<parallel>], iteration_bounds = array<i64: 2>, scalar_prefetch = 0 : i64, scratch_operands = 0 : i64, tpu.core_type = #tpu.core_type<tc>, window_params = [{transform_indices = @transform_0, window_bounds = array<i64: 1, 8, 256>}, {pipeline_mode = #tpu.pipeline_mode<synchronous>, transform_indices = @transform_1, window_bounds = array<i64: 8, 1>}, {pipeline_mode = #tpu.pipeline_mode<synchronous>, transform_indices = @transform_2, window_bounds = array<i64: 8, 1>}, {transform_indices = @transform_3, window_bounds = array<i64: 1, 8, 256>}]} {
    %c0 = arith.constant 0 : index
    %c0_0 = arith.constant 0 : index
    %c0_1 = arith.constant 0 : index
    %0 = vector.load %arg1[%c0, %c0_0, %c0_1] : memref<1x8x256xf32, #tpu.memory_space<vmem>>, vector<1x8x256xf32>
    %1 = vector.shape_cast %0 : vector<1x8x256xf32> to vector<8x256xf32>
    %c0_2 = arith.constant 0 : index
    %c0_3 = arith.constant 0 : index
    %2 = vector.load %arg2[%c0_2, %c0_3] : memref<8x1xf32, #tpu.memory_space<vmem>>, vector<8x1xf32>
    %3 = vector.broadcast %2 : vector<8x1xf32> to vector<8x256xf32>
    %4 = arith.mulf %1, %3 : vector<8x256xf32>
    %c0_4 = arith.constant 0 : index
    %c0_5 = arith.constant 0 : index
    %5 = vector.load %arg3[%c0_4, %c0_5] : memref<8x1xf32, #tpu.memory_space<vmem>>, vector<8x1xf32>
    %6 = vector.broadcast %5 : vector<8x1xf32> to vector<8x256xf32>
    %7 = arith.addf %4, %6 : vector<8x256xf32>
    %c0_6 = arith.constant 0 : index
    %c0_7 = arith.constant 0 : index
    %c0_8 = arith.constant 0 : index
    %8 = vector.load %arg4[%c0_6, %c0_7, %c0_8] : memref<1x8x256xf32, #tpu.memory_space<vmem>>, vector<1x8x256xf32>
    %9 = vector.shape_cast %8 : vector<1x8x256xf32> to vector<8x256xf32>
    %10 = vector.shape_cast %7 : vector<8x256xf32> to vector<1x8x256xf32>
    tpu.vector_store %arg4[%c0_6, %c0_7, %c0_8], %10 {strides = array<i32>} : memref<1x8x256xf32, #tpu.memory_space<vmem>>, vector<1x8x256xf32>,
    return
  }
  func.func @transform_0(%arg0: i32) -> (i32, i32, i32) {
    %c0_i32 = arith.constant 0 : i32
    %c0_i32_0 = arith.constant 0 : i32
    %c0_i32_1 = arith.constant 0 : i32
    return %arg0, %c0_i32, %c0_i32_0 : i32, i32, i32
  }
  func.func @transform_1(%arg0: i32) -> (i32, i32) {
    %c0_i32 = arith.constant 0 : i32
    %c0_i32_0 = arith.constant 0 : i32
    %c0_i32_1 = arith.constant 0 : i32
    return %c0_i32, %c0_i32_0 : i32, i32
  }
  func.func @transform_2(%arg0: i32) -> (i32, i32) {
    %c0_i32 = arith.constant 0 : i32
    %c0_i32_0 = arith.constant 0 : i32
    %c0_i32_1 = arith.constant 0 : i32
    return %c0_i32, %c0_i32_0 : i32, i32
  }
  func.func @transform_3(%arg0: i32) -> (i32, i32, i32) {
    %c0_i32 = arith.constant 0 : i32
    %c0_i32_0 = arith.constant 0 : i32
    %c0_i32_1 = arith.constant 0 : i32
    return %arg0, %c0_i32, %c0_i32_0 : i32, i32, i32
  }
}

module attributes {stable_mosaic.version = 11 : i64} {
  func.func @kernel(%arg0: i32, %arg1: memref<36xf32, #tpu.memory_space<smem>>, %arg2: memref<32xf32, #tpu.memory_space<smem>>, %arg3: memref<1x4x16x16xf32, #tpu.memory_space<vmem>>, %arg4: memref<1x8x256xf32, #tpu.memory_space<vmem>>, %arg5: memref<1x8x2xf32, #tpu.memory_space<vmem>>, %arg6: memref<4x20x20xf32, #tpu.memory_space<vmem>>, %arg7: memref<8x16x16xf32, #tpu.memory_space<vmem>>) attributes {dimension_semantics = [#tpu.dimension_semantics<parallel>], iteration_bounds = array<i64: 2>, scalar_prefetch = 0 : i64, scratch_operands = 2 : i64, tpu.core_type = #tpu.core_type<tc>, window_params = [{transform_indices = @transform_0, window_bounds = array<i64: 36>}, {transform_indices = @transform_1, window_bounds = array<i64: 32>}, {transform_indices = @transform_2, window_bounds = array<i64: 1, 4, 16, 16>}, {transform_indices = @transform_3, window_bounds = array<i64: 1, 8, 256>}, {transform_indices = @transform_4, window_bounds = array<i64: 1, 8, 2>}]} {
    %cst = arith.constant 0.000000e+00 : f32
    %0 = vector.broadcast %cst : f32 to vector<4x20x20xf32>
    %c0 = arith.constant 0 : index
    %c0_0 = arith.constant 0 : index
    %c0_1 = arith.constant 0 : index
    %1 = vector.load %arg6[%c0, %c0_0, %c0_1] : memref<4x20x20xf32, #tpu.memory_space<vmem>>, vector<4x20x20xf32>
    tpu.vector_store %arg6[%c0, %c0_0, %c0_1], %0 {strides = array<i32>} : memref<4x20x20xf32, #tpu.memory_space<vmem>>, vector<4x20x20xf32>,
    %c0_2 = arith.constant 0 : index
    %c0_3 = arith.constant 0 : index
    %c0_4 = arith.constant 0 : index
    %c0_5 = arith.constant 0 : index
    %2 = vector.load %arg3[%c0_2, %c0_3, %c0_4, %c0_5] : memref<1x4x16x16xf32, #tpu.memory_space<vmem>>, vector<1x4x16x16xf32>
    %3 = vector.shape_cast %2 : vector<1x4x16x16xf32> to vector<4x16x16xf32>
    %c0_6 = arith.constant 0 : index
    %c2 = arith.constant 2 : index
    %c2_7 = arith.constant 2 : index
    %4 = vector.load %arg6[%c0_6, %c2, %c2_7] : memref<4x20x20xf32, #tpu.memory_space<vmem>>, vector<4x16x16xf32>
    tpu.vector_store %arg6[%c0_6, %c2, %c2_7], %3 {strides = array<i32>} : memref<4x20x20xf32, #tpu.memory_space<vmem>>, vector<4x16x16xf32>,
    %c0_8 = arith.constant 0 : index
    %c0_9 = arith.constant 0 : index
    %c0_10 = arith.constant 0 : index
    %5 = vector.load %arg6[%c0_8, %c0_9, %c0_10] : memref<4x20x20xf32, #tpu.memory_space<vmem>>, vector<1x20x20xf32>
    %6 = vector.shape_cast %5 : vector<1x20x20xf32> to vector<20x20xf32>
    %cst_11 = arith.constant 0.000000e+00 : f32
    %7 = vector.broadcast %cst_11 : f32 to vector<16x16xf32>
    %8 = vector.extract_strided_slice %6 {offsets = [0, 0], sizes = [16, 16], strides = [1, 1]} : vector<20x20xf32> to vector<16x16xf32>
    %c0_12 = arith.constant 0 : index
    %9 = memref.load %arg1[%c0_12] : memref<36xf32, #tpu.memory_space<smem>>
    %10 = vector.broadcast %9 : f32 to vector<16x16xf32>
    %11 = arith.mulf %8, %10 : vector<16x16xf32>
    %12 = arith.addf %7, %11 : vector<16x16xf32>
    %13 = vector.extract_strided_slice %6 {offsets = [0, 2], sizes = [16, 16], strides = [1, 1]} : vector<20x20xf32> to vector<16x16xf32>
    %c4 = arith.constant 4 : index
    %14 = memref.load %arg1[%c4] : memref<36xf32, #tpu.memory_space<smem>>
    %15 = vector.broadcast %14 : f32 to vector<16x16xf32>
    %16 = arith.mulf %13, %15 : vector<16x16xf32>
    %17 = arith.addf %12, %16 : vector<16x16xf32>
    %18 = vector.extract_strided_slice %6 {offsets = [0, 4], sizes = [16, 16], strides = [1, 1]} : vector<20x20xf32> to vector<16x16xf32>
    %c8 = arith.constant 8 : index
    %19 = memref.load %arg1[%c8] : memref<36xf32, #tpu.memory_space<smem>>
    %20 = vector.broadcast %19 : f32 to vector<16x16xf32>
    %21 = arith.mulf %18, %20 : vector<16x16xf32>
    %22 = arith.addf %17, %21 : vector<16x16xf32>
    %23 = vector.extract_strided_slice %6 {offsets = [2, 0], sizes = [16, 16], strides = [1, 1]} : vector<20x20xf32> to vector<16x16xf32>
    %c12 = arith.constant 12 : index
    %24 = memref.load %arg1[%c12] : memref<36xf32, #tpu.memory_space<smem>>
    %25 = vector.broadcast %24 : f32 to vector<16x16xf32>
    %26 = arith.mulf %23, %25 : vector<16x16xf32>
    %27 = arith.addf %22, %26 : vector<16x16xf32>
    %28 = vector.extract_strided_slice %6 {offsets = [2, 2], sizes = [16, 16], strides = [1, 1]} : vector<20x20xf32> to vector<16x16xf32>
    %c16 = arith.constant 16 : index
    %29 = memref.load %arg1[%c16] : memref<36xf32, #tpu.memory_space<smem>>
    %30 = vector.broadcast %29 : f32 to vector<16x16xf32>
    %31 = arith.mulf %28, %30 : vector<16x16xf32>
    %32 = arith.addf %27, %31 : vector<16x16xf32>
    %33 = vector.extract_strided_slice %6 {offsets = [2, 4], sizes = [16, 16], strides = [1, 1]} : vector<20x20xf32> to vector<16x16xf32>
    %c20 = arith.constant 20 : index
    %34 = memref.load %arg1[%c20] : memref<36xf32, #tpu.memory_space<smem>>
    %35 = vector.broadcast %34 : f32 to vector<16x16xf32>
    %36 = arith.mulf %33, %35 : vector<16x16xf32>
    %37 = arith.addf %32, %36 : vector<16x16xf32>
    %38 = vector.extract_strided_slice %6 {offsets = [4, 0], sizes = [16, 16], strides = [1, 1]} : vector<20x20xf32> to vector<16x16xf32>
    %c24 = arith.constant 24 : index
    %39 = memref.load %arg1[%c24] : memref<36xf32, #tpu.memory_space<smem>>
    %40 = vector.broadcast %39 : f32 to vector<16x16xf32>
    %41 = arith.mulf %38, %40 : vector<16x16xf32>
    %42 = arith.addf %37, %41 : vector<16x16xf32>
    %43 = vector.extract_strided_slice %6 {offsets = [4, 2], sizes = [16, 16], strides = [1, 1]} : vector<20x20xf32> to vector<16x16xf32>
    %c28 = arith.constant 28 : index
    %44 = memref.load %arg1[%c28] : memref<36xf32, #tpu.memory_space<smem>>
    %45 = vector.broadcast %44 : f32 to vector<16x16xf32>
    %46 = arith.mulf %43, %45 : vector<16x16xf32>
    %47 = arith.addf %42, %46 : vector<16x16xf32>
    %48 = vector.extract_strided_slice %6 {offsets = [4, 4], sizes = [16, 16], strides = [1, 1]} : vector<20x20xf32> to vector<16x16xf32>
    %c32 = arith.constant 32 : index
    %49 = memref.load %arg1[%c32] : memref<36xf32, #tpu.memory_space<smem>>
    %50 = vector.broadcast %49 : f32 to vector<16x16xf32>
    %51 = arith.mulf %48, %50 : vector<16x16xf32>
    %52 = arith.addf %47, %51 : vector<16x16xf32>
    %c1 = arith.constant 1 : index
    %c0_13 = arith.constant 0 : index
    %c0_14 = arith.constant 0 : index
    %53 = vector.load %arg6[%c1, %c0_13, %c0_14] : memref<4x20x20xf32, #tpu.memory_space<vmem>>, vector<1x20x20xf32>
    %54 = vector.shape_cast %53 : vector<1x20x20xf32> to vector<20x20xf32>
    %cst_15 = arith.constant 0.000000e+00 : f32
    %55 = vector.broadcast %cst_15 : f32 to vector<16x16xf32>
    %56 = vector.extract_strided_slice %54 {offsets = [0, 0], sizes = [16, 16], strides = [1, 1]} : vector<20x20xf32> to vector<16x16xf32>
    %c1_16 = arith.constant 1 : index
    %57 = memref.load %arg1[%c1_16] : memref<36xf32, #tpu.memory_space<smem>>
    %58 = vector.broadcast %57 : f32 to vector<16x16xf32>
    %59 = arith.mulf %56, %58 : vector<16x16xf32>
    %60 = arith.addf %55, %59 : vector<16x16xf32>
    %61 = vector.extract_strided_slice %54 {offsets = [0, 2], sizes = [16, 16], strides = [1, 1]} : vector<20x20xf32> to vector<16x16xf32>
    %c5 = arith.constant 5 : index
    %62 = memref.load %arg1[%c5] : memref<36xf32, #tpu.memory_space<smem>>
    %63 = vector.broadcast %62 : f32 to vector<16x16xf32>
    %64 = arith.mulf %61, %63 : vector<16x16xf32>
    %65 = arith.addf %60, %64 : vector<16x16xf32>
    %66 = vector.extract_strided_slice %54 {offsets = [0, 4], sizes = [16, 16], strides = [1, 1]} : vector<20x20xf32> to vector<16x16xf32>
    %c9 = arith.constant 9 : index
    %67 = memref.load %arg1[%c9] : memref<36xf32, #tpu.memory_space<smem>>
    %68 = vector.broadcast %67 : f32 to vector<16x16xf32>
    %69 = arith.mulf %66, %68 : vector<16x16xf32>
    %70 = arith.addf %65, %69 : vector<16x16xf32>
    %71 = vector.extract_strided_slice %54 {offsets = [2, 0], sizes = [16, 16], strides = [1, 1]} : vector<20x20xf32> to vector<16x16xf32>
    %c13 = arith.constant 13 : index
    %72 = memref.load %arg1[%c13] : memref<36xf32, #tpu.memory_space<smem>>
    %73 = vector.broadcast %72 : f32 to vector<16x16xf32>
    %74 = arith.mulf %71, %73 : vector<16x16xf32>
    %75 = arith.addf %70, %74 : vector<16x16xf32>
    %76 = vector.extract_strided_slice %54 {offsets = [2, 2], sizes = [16, 16], strides = [1, 1]} : vector<20x20xf32> to vector<16x16xf32>
    %c17 = arith.constant 17 : index
    %77 = memref.load %arg1[%c17] : memref<36xf32, #tpu.memory_space<smem>>
    %78 = vector.broadcast %77 : f32 to vector<16x16xf32>
    %79 = arith.mulf %76, %78 : vector<16x16xf32>
    %80 = arith.addf %75, %79 : vector<16x16xf32>
    %81 = vector.extract_strided_slice %54 {offsets = [2, 4], sizes = [16, 16], strides = [1, 1]} : vector<20x20xf32> to vector<16x16xf32>
    %c21 = arith.constant 21 : index
    %82 = memref.load %arg1[%c21] : memref<36xf32, #tpu.memory_space<smem>>
    %83 = vector.broadcast %82 : f32 to vector<16x16xf32>
    %84 = arith.mulf %81, %83 : vector<16x16xf32>
    %85 = arith.addf %80, %84 : vector<16x16xf32>
    %86 = vector.extract_strided_slice %54 {offsets = [4, 0], sizes = [16, 16], strides = [1, 1]} : vector<20x20xf32> to vector<16x16xf32>
    %c25 = arith.constant 25 : index
    %87 = memref.load %arg1[%c25] : memref<36xf32, #tpu.memory_space<smem>>
    %88 = vector.broadcast %87 : f32 to vector<16x16xf32>
    %89 = arith.mulf %86, %88 : vector<16x16xf32>
    %90 = arith.addf %85, %89 : vector<16x16xf32>
    %91 = vector.extract_strided_slice %54 {offsets = [4, 2], sizes = [16, 16], strides = [1, 1]} : vector<20x20xf32> to vector<16x16xf32>
    %c29 = arith.constant 29 : index
    %92 = memref.load %arg1[%c29] : memref<36xf32, #tpu.memory_space<smem>>
    %93 = vector.broadcast %92 : f32 to vector<16x16xf32>
    %94 = arith.mulf %91, %93 : vector<16x16xf32>
    %95 = arith.addf %90, %94 : vector<16x16xf32>
    %96 = vector.extract_strided_slice %54 {offsets = [4, 4], sizes = [16, 16], strides = [1, 1]} : vector<20x20xf32> to vector<16x16xf32>
    %c33 = arith.constant 33 : index
    %97 = memref.load %arg1[%c33] : memref<36xf32, #tpu.memory_space<smem>>
    %98 = vector.broadcast %97 : f32 to vector<16x16xf32>
    %99 = arith.mulf %96, %98 : vector<16x16xf32>
    %100 = arith.addf %95, %99 : vector<16x16xf32>
    %c2_17 = arith.constant 2 : index
    %c0_18 = arith.constant 0 : index
    %c0_19 = arith.constant 0 : index
    %101 = vector.load %arg6[%c2_17, %c0_18, %c0_19] : memref<4x20x20xf32, #tpu.memory_space<vmem>>, vector<1x20x20xf32>
    %102 = vector.shape_cast %101 : vector<1x20x20xf32> to vector<20x20xf32>
    %cst_20 = arith.constant 0.000000e+00 : f32
    %103 = vector.broadcast %cst_20 : f32 to vector<16x16xf32>
    %104 = vector.extract_strided_slice %102 {offsets = [0, 0], sizes = [16, 16], strides = [1, 1]} : vector<20x20xf32> to vector<16x16xf32>
    %c2_21 = arith.constant 2 : index
    %105 = memref.load %arg1[%c2_21] : memref<36xf32, #tpu.memory_space<smem>>
    %106 = vector.broadcast %105 : f32 to vector<16x16xf32>
    %107 = arith.mulf %104, %106 : vector<16x16xf32>
    %108 = arith.addf %103, %107 : vector<16x16xf32>
    %109 = vector.extract_strided_slice %102 {offsets = [0, 2], sizes = [16, 16], strides = [1, 1]} : vector<20x20xf32> to vector<16x16xf32>
    %c6 = arith.constant 6 : index
    %110 = memref.load %arg1[%c6] : memref<36xf32, #tpu.memory_space<smem>>
    %111 = vector.broadcast %110 : f32 to vector<16x16xf32>
    %112 = arith.mulf %109, %111 : vector<16x16xf32>
    %113 = arith.addf %108, %112 : vector<16x16xf32>
    %114 = vector.extract_strided_slice %102 {offsets = [0, 4], sizes = [16, 16], strides = [1, 1]} : vector<20x20xf32> to vector<16x16xf32>
    %c10 = arith.constant 10 : index
    %115 = memref.load %arg1[%c10] : memref<36xf32, #tpu.memory_space<smem>>
    %116 = vector.broadcast %115 : f32 to vector<16x16xf32>
    %117 = arith.mulf %114, %116 : vector<16x16xf32>
    %118 = arith.addf %113, %117 : vector<16x16xf32>
    %119 = vector.extract_strided_slice %102 {offsets = [2, 0], sizes = [16, 16], strides = [1, 1]} : vector<20x20xf32> to vector<16x16xf32>
    %c14 = arith.constant 14 : index
    %120 = memref.load %arg1[%c14] : memref<36xf32, #tpu.memory_space<smem>>
    %121 = vector.broadcast %120 : f32 to vector<16x16xf32>
    %122 = arith.mulf %119, %121 : vector<16x16xf32>
    %123 = arith.addf %118, %122 : vector<16x16xf32>
    %124 = vector.extract_strided_slice %102 {offsets = [2, 2], sizes = [16, 16], strides = [1, 1]} : vector<20x20xf32> to vector<16x16xf32>
    %c18 = arith.constant 18 : index
    %125 = memref.load %arg1[%c18] : memref<36xf32, #tpu.memory_space<smem>>
    %126 = vector.broadcast %125 : f32 to vector<16x16xf32>
    %127 = arith.mulf %124, %126 : vector<16x16xf32>
    %128 = arith.addf %123, %127 : vector<16x16xf32>
    %129 = vector.extract_strided_slice %102 {offsets = [2, 4], sizes = [16, 16], strides = [1, 1]} : vector<20x20xf32> to vector<16x16xf32>
    %c22 = arith.constant 22 : index
    %130 = memref.load %arg1[%c22] : memref<36xf32, #tpu.memory_space<smem>>
    %131 = vector.broadcast %130 : f32 to vector<16x16xf32>
    %132 = arith.mulf %129, %131 : vector<16x16xf32>
    %133 = arith.addf %128, %132 : vector<16x16xf32>
    %134 = vector.extract_strided_slice %102 {offsets = [4, 0], sizes = [16, 16], strides = [1, 1]} : vector<20x20xf32> to vector<16x16xf32>
    %c26 = arith.constant 26 : index
    %135 = memref.load %arg1[%c26] : memref<36xf32, #tpu.memory_space<smem>>
    %136 = vector.broadcast %135 : f32 to vector<16x16xf32>
    %137 = arith.mulf %134, %136 : vector<16x16xf32>
    %138 = arith.addf %133, %137 : vector<16x16xf32>
    %139 = vector.extract_strided_slice %102 {offsets = [4, 2], sizes = [16, 16], strides = [1, 1]} : vector<20x20xf32> to vector<16x16xf32>
    %c30 = arith.constant 30 : index
    %140 = memref.load %arg1[%c30] : memref<36xf32, #tpu.memory_space<smem>>
    %141 = vector.broadcast %140 : f32 to vector<16x16xf32>
    %142 = arith.mulf %139, %141 : vector<16x16xf32>
    %143 = arith.addf %138, %142 : vector<16x16xf32>
    %144 = vector.extract_strided_slice %102 {offsets = [4, 4], sizes = [16, 16], strides = [1, 1]} : vector<20x20xf32> to vector<16x16xf32>
    %c34 = arith.constant 34 : index
    %145 = memref.load %arg1[%c34] : memref<36xf32, #tpu.memory_space<smem>>
    %146 = vector.broadcast %145 : f32 to vector<16x16xf32>
    %147 = arith.mulf %144, %146 : vector<16x16xf32>
    %148 = arith.addf %143, %147 : vector<16x16xf32>
    %c3 = arith.constant 3 : index
    %c0_22 = arith.constant 0 : index
    %c0_23 = arith.constant 0 : index
    %149 = vector.load %arg6[%c3, %c0_22, %c0_23] : memref<4x20x20xf32, #tpu.memory_space<vmem>>, vector<1x20x20xf32>
    %150 = vector.shape_cast %149 : vector<1x20x20xf32> to vector<20x20xf32>
    %cst_24 = arith.constant 0.000000e+00 : f32
    %151 = vector.broadcast %cst_24 : f32 to vector<16x16xf32>
    %152 = vector.extract_strided_slice %150 {offsets = [0, 0], sizes = [16, 16], strides = [1, 1]} : vector<20x20xf32> to vector<16x16xf32>
    %c3_25 = arith.constant 3 : index
    %153 = memref.load %arg1[%c3_25] : memref<36xf32, #tpu.memory_space<smem>>
    %154 = vector.broadcast %153 : f32 to vector<16x16xf32>
    %155 = arith.mulf %152, %154 : vector<16x16xf32>
    %156 = arith.addf %151, %155 : vector<16x16xf32>
    %157 = vector.extract_strided_slice %150 {offsets = [0, 2], sizes = [16, 16], strides = [1, 1]} : vector<20x20xf32> to vector<16x16xf32>
    %c7 = arith.constant 7 : index
    %158 = memref.load %arg1[%c7] : memref<36xf32, #tpu.memory_space<smem>>
    %159 = vector.broadcast %158 : f32 to vector<16x16xf32>
    %160 = arith.mulf %157, %159 : vector<16x16xf32>
    %161 = arith.addf %156, %160 : vector<16x16xf32>
    %162 = vector.extract_strided_slice %150 {offsets = [0, 4], sizes = [16, 16], strides = [1, 1]} : vector<20x20xf32> to vector<16x16xf32>
    %c11 = arith.constant 11 : index
    %163 = memref.load %arg1[%c11] : memref<36xf32, #tpu.memory_space<smem>>
    %164 = vector.broadcast %163 : f32 to vector<16x16xf32>
    %165 = arith.mulf %162, %164 : vector<16x16xf32>
    %166 = arith.addf %161, %165 : vector<16x16xf32>
    %167 = vector.extract_strided_slice %150 {offsets = [2, 0], sizes = [16, 16], strides = [1, 1]} : vector<20x20xf32> to vector<16x16xf32>
    %c15 = arith.constant 15 : index
    %168 = memref.load %arg1[%c15] : memref<36xf32, #tpu.memory_space<smem>>
    %169 = vector.broadcast %168 : f32 to vector<16x16xf32>
    %170 = arith.mulf %167, %169 : vector<16x16xf32>
    %171 = arith.addf %166, %170 : vector<16x16xf32>
    %172 = vector.extract_strided_slice %150 {offsets = [2, 2], sizes = [16, 16], strides = [1, 1]} : vector<20x20xf32> to vector<16x16xf32>
    %c19 = arith.constant 19 : index
    %173 = memref.load %arg1[%c19] : memref<36xf32, #tpu.memory_space<smem>>
    %174 = vector.broadcast %173 : f32 to vector<16x16xf32>
    %175 = arith.mulf %172, %174 : vector<16x16xf32>
    %176 = arith.addf %171, %175 : vector<16x16xf32>
    %177 = vector.extract_strided_slice %150 {offsets = [2, 4], sizes = [16, 16], strides = [1, 1]} : vector<20x20xf32> to vector<16x16xf32>
    %c23 = arith.constant 23 : index
    %178 = memref.load %arg1[%c23] : memref<36xf32, #tpu.memory_space<smem>>
    %179 = vector.broadcast %178 : f32 to vector<16x16xf32>
    %180 = arith.mulf %177, %179 : vector<16x16xf32>
    %181 = arith.addf %176, %180 : vector<16x16xf32>
    %182 = vector.extract_strided_slice %150 {offsets = [4, 0], sizes = [16, 16], strides = [1, 1]} : vector<20x20xf32> to vector<16x16xf32>
    %c27 = arith.constant 27 : index
    %183 = memref.load %arg1[%c27] : memref<36xf32, #tpu.memory_space<smem>>
    %184 = vector.broadcast %183 : f32 to vector<16x16xf32>
    %185 = arith.mulf %182, %184 : vector<16x16xf32>
    %186 = arith.addf %181, %185 : vector<16x16xf32>
    %187 = vector.extract_strided_slice %150 {offsets = [4, 2], sizes = [16, 16], strides = [1, 1]} : vector<20x20xf32> to vector<16x16xf32>
    %c31 = arith.constant 31 : index
    %188 = memref.load %arg1[%c31] : memref<36xf32, #tpu.memory_space<smem>>
    %189 = vector.broadcast %188 : f32 to vector<16x16xf32>
    %190 = arith.mulf %187, %189 : vector<16x16xf32>
    %191 = arith.addf %186, %190 : vector<16x16xf32>
    %192 = vector.extract_strided_slice %150 {offsets = [4, 4], sizes = [16, 16], strides = [1, 1]} : vector<20x20xf32> to vector<16x16xf32>
    %c35 = arith.constant 35 : index
    %193 = memref.load %arg1[%c35] : memref<36xf32, #tpu.memory_space<smem>>
    %194 = vector.broadcast %193 : f32 to vector<16x16xf32>
    %195 = arith.mulf %192, %194 : vector<16x16xf32>
    %196 = arith.addf %191, %195 : vector<16x16xf32>
    %c0_26 = arith.constant 0 : index
    %197 = memref.load %arg2[%c0_26] : memref<32xf32, #tpu.memory_space<smem>>
    %198 = vector.broadcast %197 : f32 to vector<16x16xf32>
    %199 = arith.mulf %52, %198 : vector<16x16xf32>
    %c8_27 = arith.constant 8 : index
    %200 = memref.load %arg2[%c8_27] : memref<32xf32, #tpu.memory_space<smem>>
    %201 = vector.broadcast %200 : f32 to vector<16x16xf32>
    %202 = arith.mulf %100, %201 : vector<16x16xf32>
    %203 = arith.addf %199, %202 : vector<16x16xf32>
    %c16_28 = arith.constant 16 : index
    %204 = memref.load %arg2[%c16_28] : memref<32xf32, #tpu.memory_space<smem>>
    %205 = vector.broadcast %204 : f32 to vector<16x16xf32>
    %206 = arith.mulf %148, %205 : vector<16x16xf32>
    %207 = arith.addf %203, %206 : vector<16x16xf32>
    %c24_29 = arith.constant 24 : index
    %208 = memref.load %arg2[%c24_29] : memref<32xf32, #tpu.memory_space<smem>>
    %209 = vector.broadcast %208 : f32 to vector<16x16xf32>
    %210 = arith.mulf %196, %209 : vector<16x16xf32>
    %211 = arith.addf %207, %210 : vector<16x16xf32>
    %c0_30 = arith.constant 0 : index
    %c0_31 = arith.constant 0 : index
    %c0_32 = arith.constant 0 : index
    %212 = vector.load %arg7[%c0_30, %c0_31, %c0_32] : memref<8x16x16xf32, #tpu.memory_space<vmem>>, vector<1x16x16xf32>
    %213 = vector.shape_cast %212 : vector<1x16x16xf32> to vector<16x16xf32>
    %214 = vector.shape_cast %211 : vector<16x16xf32> to vector<1x16x16xf32>
    tpu.vector_store %arg7[%c0_30, %c0_31, %c0_32], %214 {strides = array<i32>} : memref<8x16x16xf32, #tpu.memory_space<vmem>>, vector<1x16x16xf32>,
    %c1_33 = arith.constant 1 : index
    %215 = memref.load %arg2[%c1_33] : memref<32xf32, #tpu.memory_space<smem>>
    %216 = vector.broadcast %215 : f32 to vector<16x16xf32>
    %217 = arith.mulf %52, %216 : vector<16x16xf32>
    %c9_34 = arith.constant 9 : index
    %218 = memref.load %arg2[%c9_34] : memref<32xf32, #tpu.memory_space<smem>>
    %219 = vector.broadcast %218 : f32 to vector<16x16xf32>
    %220 = arith.mulf %100, %219 : vector<16x16xf32>
    %221 = arith.addf %217, %220 : vector<16x16xf32>
    %c17_35 = arith.constant 17 : index
    %222 = memref.load %arg2[%c17_35] : memref<32xf32, #tpu.memory_space<smem>>
    %223 = vector.broadcast %222 : f32 to vector<16x16xf32>
    %224 = arith.mulf %148, %223 : vector<16x16xf32>
    %225 = arith.addf %221, %224 : vector<16x16xf32>
    %c25_36 = arith.constant 25 : index
    %226 = memref.load %arg2[%c25_36] : memref<32xf32, #tpu.memory_space<smem>>
    %227 = vector.broadcast %226 : f32 to vector<16x16xf32>
    %228 = arith.mulf %196, %227 : vector<16x16xf32>
    %229 = arith.addf %225, %228 : vector<16x16xf32>
    %c1_37 = arith.constant 1 : index
    %c0_38 = arith.constant 0 : index
    %c0_39 = arith.constant 0 : index
    %230 = vector.load %arg7[%c1_37, %c0_38, %c0_39] : memref<8x16x16xf32, #tpu.memory_space<vmem>>, vector<1x16x16xf32>
    %231 = vector.shape_cast %230 : vector<1x16x16xf32> to vector<16x16xf32>
    %232 = vector.shape_cast %229 : vector<16x16xf32> to vector<1x16x16xf32>
    tpu.vector_store %arg7[%c1_37, %c0_38, %c0_39], %232 {strides = array<i32>} : memref<8x16x16xf32, #tpu.memory_space<vmem>>, vector<1x16x16xf32>,
    %c2_40 = arith.constant 2 : index
    %233 = memref.load %arg2[%c2_40] : memref<32xf32, #tpu.memory_space<smem>>
    %234 = vector.broadcast %233 : f32 to vector<16x16xf32>
    %235 = arith.mulf %52, %234 : vector<16x16xf32>
    %c10_41 = arith.constant 10 : index
    %236 = memref.load %arg2[%c10_41] : memref<32xf32, #tpu.memory_space<smem>>
    %237 = vector.broadcast %236 : f32 to vector<16x16xf32>
    %238 = arith.mulf %100, %237 : vector<16x16xf32>
    %239 = arith.addf %235, %238 : vector<16x16xf32>
    %c18_42 = arith.constant 18 : index
    %240 = memref.load %arg2[%c18_42] : memref<32xf32, #tpu.memory_space<smem>>
    %241 = vector.broadcast %240 : f32 to vector<16x16xf32>
    %242 = arith.mulf %148, %241 : vector<16x16xf32>
    %243 = arith.addf %239, %242 : vector<16x16xf32>
    %c26_43 = arith.constant 26 : index
    %244 = memref.load %arg2[%c26_43] : memref<32xf32, #tpu.memory_space<smem>>
    %245 = vector.broadcast %244 : f32 to vector<16x16xf32>
    %246 = arith.mulf %196, %245 : vector<16x16xf32>
    %247 = arith.addf %243, %246 : vector<16x16xf32>
    %c2_44 = arith.constant 2 : index
    %c0_45 = arith.constant 0 : index
    %c0_46 = arith.constant 0 : index
    %248 = vector.load %arg7[%c2_44, %c0_45, %c0_46] : memref<8x16x16xf32, #tpu.memory_space<vmem>>, vector<1x16x16xf32>
    %249 = vector.shape_cast %248 : vector<1x16x16xf32> to vector<16x16xf32>
    %250 = vector.shape_cast %247 : vector<16x16xf32> to vector<1x16x16xf32>
    tpu.vector_store %arg7[%c2_44, %c0_45, %c0_46], %250 {strides = array<i32>} : memref<8x16x16xf32, #tpu.memory_space<vmem>>, vector<1x16x16xf32>,
    %c3_47 = arith.constant 3 : index
    %251 = memref.load %arg2[%c3_47] : memref<32xf32, #tpu.memory_space<smem>>
    %252 = vector.broadcast %251 : f32 to vector<16x16xf32>
    %253 = arith.mulf %52, %252 : vector<16x16xf32>
    %c11_48 = arith.constant 11 : index
    %254 = memref.load %arg2[%c11_48] : memref<32xf32, #tpu.memory_space<smem>>
    %255 = vector.broadcast %254 : f32 to vector<16x16xf32>
    %256 = arith.mulf %100, %255 : vector<16x16xf32>
    %257 = arith.addf %253, %256 : vector<16x16xf32>
    %c19_49 = arith.constant 19 : index
    %258 = memref.load %arg2[%c19_49] : memref<32xf32, #tpu.memory_space<smem>>
    %259 = vector.broadcast %258 : f32 to vector<16x16xf32>
    %260 = arith.mulf %148, %259 : vector<16x16xf32>
    %261 = arith.addf %257, %260 : vector<16x16xf32>
    %c27_50 = arith.constant 27 : index
    %262 = memref.load %arg2[%c27_50] : memref<32xf32, #tpu.memory_space<smem>>
    %263 = vector.broadcast %262 : f32 to vector<16x16xf32>
    %264 = arith.mulf %196, %263 : vector<16x16xf32>
    %265 = arith.addf %261, %264 : vector<16x16xf32>
    %c3_51 = arith.constant 3 : index
    %c0_52 = arith.constant 0 : index
    %c0_53 = arith.constant 0 : index
    %266 = vector.load %arg7[%c3_51, %c0_52, %c0_53] : memref<8x16x16xf32, #tpu.memory_space<vmem>>, vector<1x16x16xf32>
    %267 = vector.shape_cast %266 : vector<1x16x16xf32> to vector<16x16xf32>
    %268 = vector.shape_cast %265 : vector<16x16xf32> to vector<1x16x16xf32>
    tpu.vector_store %arg7[%c3_51, %c0_52, %c0_53], %268 {strides = array<i32>} : memref<8x16x16xf32, #tpu.memory_space<vmem>>, vector<1x16x16xf32>,
    %c4_54 = arith.constant 4 : index
    %269 = memref.load %arg2[%c4_54] : memref<32xf32, #tpu.memory_space<smem>>
    %270 = vector.broadcast %269 : f32 to vector<16x16xf32>
    %271 = arith.mulf %52, %270 : vector<16x16xf32>
    %c12_55 = arith.constant 12 : index
    %272 = memref.load %arg2[%c12_55] : memref<32xf32, #tpu.memory_space<smem>>
    %273 = vector.broadcast %272 : f32 to vector<16x16xf32>
    %274 = arith.mulf %100, %273 : vector<16x16xf32>
    %275 = arith.addf %271, %274 : vector<16x16xf32>
    %c20_56 = arith.constant 20 : index
    %276 = memref.load %arg2[%c20_56] : memref<32xf32, #tpu.memory_space<smem>>
    %277 = vector.broadcast %276 : f32 to vector<16x16xf32>
    %278 = arith.mulf %148, %277 : vector<16x16xf32>
    %279 = arith.addf %275, %278 : vector<16x16xf32>
    %c28_57 = arith.constant 28 : index
    %280 = memref.load %arg2[%c28_57] : memref<32xf32, #tpu.memory_space<smem>>
    %281 = vector.broadcast %280 : f32 to vector<16x16xf32>
    %282 = arith.mulf %196, %281 : vector<16x16xf32>
    %283 = arith.addf %279, %282 : vector<16x16xf32>
    %c4_58 = arith.constant 4 : index
    %c0_59 = arith.constant 0 : index
    %c0_60 = arith.constant 0 : index
    %284 = vector.load %arg7[%c4_58, %c0_59, %c0_60] : memref<8x16x16xf32, #tpu.memory_space<vmem>>, vector<1x16x16xf32>
    %285 = vector.shape_cast %284 : vector<1x16x16xf32> to vector<16x16xf32>
    %286 = vector.shape_cast %283 : vector<16x16xf32> to vector<1x16x16xf32>
    tpu.vector_store %arg7[%c4_58, %c0_59, %c0_60], %286 {strides = array<i32>} : memref<8x16x16xf32, #tpu.memory_space<vmem>>, vector<1x16x16xf32>,
    %c5_61 = arith.constant 5 : index
    %287 = memref.load %arg2[%c5_61] : memref<32xf32, #tpu.memory_space<smem>>
    %288 = vector.broadcast %287 : f32 to vector<16x16xf32>
    %289 = arith.mulf %52, %288 : vector<16x16xf32>
    %c13_62 = arith.constant 13 : index
    %290 = memref.load %arg2[%c13_62] : memref<32xf32, #tpu.memory_space<smem>>
    %291 = vector.broadcast %290 : f32 to vector<16x16xf32>
    %292 = arith.mulf %100, %291 : vector<16x16xf32>
    %293 = arith.addf %289, %292 : vector<16x16xf32>
    %c21_63 = arith.constant 21 : index
    %294 = memref.load %arg2[%c21_63] : memref<32xf32, #tpu.memory_space<smem>>
    %295 = vector.broadcast %294 : f32 to vector<16x16xf32>
    %296 = arith.mulf %148, %295 : vector<16x16xf32>
    %297 = arith.addf %293, %296 : vector<16x16xf32>
    %c29_64 = arith.constant 29 : index
    %298 = memref.load %arg2[%c29_64] : memref<32xf32, #tpu.memory_space<smem>>
    %299 = vector.broadcast %298 : f32 to vector<16x16xf32>
    %300 = arith.mulf %196, %299 : vector<16x16xf32>
    %301 = arith.addf %297, %300 : vector<16x16xf32>
    %c5_65 = arith.constant 5 : index
    %c0_66 = arith.constant 0 : index
    %c0_67 = arith.constant 0 : index
    %302 = vector.load %arg7[%c5_65, %c0_66, %c0_67] : memref<8x16x16xf32, #tpu.memory_space<vmem>>, vector<1x16x16xf32>
    %303 = vector.shape_cast %302 : vector<1x16x16xf32> to vector<16x16xf32>
    %304 = vector.shape_cast %301 : vector<16x16xf32> to vector<1x16x16xf32>
    tpu.vector_store %arg7[%c5_65, %c0_66, %c0_67], %304 {strides = array<i32>} : memref<8x16x16xf32, #tpu.memory_space<vmem>>, vector<1x16x16xf32>,
    %c6_68 = arith.constant 6 : index
    %305 = memref.load %arg2[%c6_68] : memref<32xf32, #tpu.memory_space<smem>>
    %306 = vector.broadcast %305 : f32 to vector<16x16xf32>
    %307 = arith.mulf %52, %306 : vector<16x16xf32>
    %c14_69 = arith.constant 14 : index
    %308 = memref.load %arg2[%c14_69] : memref<32xf32, #tpu.memory_space<smem>>
    %309 = vector.broadcast %308 : f32 to vector<16x16xf32>
    %310 = arith.mulf %100, %309 : vector<16x16xf32>
    %311 = arith.addf %307, %310 : vector<16x16xf32>
    %c22_70 = arith.constant 22 : index
    %312 = memref.load %arg2[%c22_70] : memref<32xf32, #tpu.memory_space<smem>>
    %313 = vector.broadcast %312 : f32 to vector<16x16xf32>
    %314 = arith.mulf %148, %313 : vector<16x16xf32>
    %315 = arith.addf %311, %314 : vector<16x16xf32>
    %c30_71 = arith.constant 30 : index
    %316 = memref.load %arg2[%c30_71] : memref<32xf32, #tpu.memory_space<smem>>
    %317 = vector.broadcast %316 : f32 to vector<16x16xf32>
    %318 = arith.mulf %196, %317 : vector<16x16xf32>
    %319 = arith.addf %315, %318 : vector<16x16xf32>
    %c6_72 = arith.constant 6 : index
    %c0_73 = arith.constant 0 : index
    %c0_74 = arith.constant 0 : index
    %320 = vector.load %arg7[%c6_72, %c0_73, %c0_74] : memref<8x16x16xf32, #tpu.memory_space<vmem>>, vector<1x16x16xf32>
    %321 = vector.shape_cast %320 : vector<1x16x16xf32> to vector<16x16xf32>
    %322 = vector.shape_cast %319 : vector<16x16xf32> to vector<1x16x16xf32>
    tpu.vector_store %arg7[%c6_72, %c0_73, %c0_74], %322 {strides = array<i32>} : memref<8x16x16xf32, #tpu.memory_space<vmem>>, vector<1x16x16xf32>,
    %c7_75 = arith.constant 7 : index
    %323 = memref.load %arg2[%c7_75] : memref<32xf32, #tpu.memory_space<smem>>
    %324 = vector.broadcast %323 : f32 to vector<16x16xf32>
    %325 = arith.mulf %52, %324 : vector<16x16xf32>
    %c15_76 = arith.constant 15 : index
    %326 = memref.load %arg2[%c15_76] : memref<32xf32, #tpu.memory_space<smem>>
    %327 = vector.broadcast %326 : f32 to vector<16x16xf32>
    %328 = arith.mulf %100, %327 : vector<16x16xf32>
    %329 = arith.addf %325, %328 : vector<16x16xf32>
    %c23_77 = arith.constant 23 : index
    %330 = memref.load %arg2[%c23_77] : memref<32xf32, #tpu.memory_space<smem>>
    %331 = vector.broadcast %330 : f32 to vector<16x16xf32>
    %332 = arith.mulf %148, %331 : vector<16x16xf32>
    %333 = arith.addf %329, %332 : vector<16x16xf32>
    %c31_78 = arith.constant 31 : index
    %334 = memref.load %arg2[%c31_78] : memref<32xf32, #tpu.memory_space<smem>>
    %335 = vector.broadcast %334 : f32 to vector<16x16xf32>
    %336 = arith.mulf %196, %335 : vector<16x16xf32>
    %337 = arith.addf %333, %336 : vector<16x16xf32>
    %c7_79 = arith.constant 7 : index
    %c0_80 = arith.constant 0 : index
    %c0_81 = arith.constant 0 : index
    %338 = vector.load %arg7[%c7_79, %c0_80, %c0_81] : memref<8x16x16xf32, #tpu.memory_space<vmem>>, vector<1x16x16xf32>
    %339 = vector.shape_cast %338 : vector<1x16x16xf32> to vector<16x16xf32>
    %340 = vector.shape_cast %337 : vector<16x16xf32> to vector<1x16x16xf32>
    tpu.vector_store %arg7[%c7_79, %c0_80, %c0_81], %340 {strides = array<i32>} : memref<8x16x16xf32, #tpu.memory_space<vmem>>, vector<1x16x16xf32>,
    %c0_82 = arith.constant 0 : index
    %c0_83 = arith.constant 0 : index
    %c0_84 = arith.constant 0 : index
    %341 = vector.load %arg7[%c0_82, %c0_83, %c0_84] : memref<8x16x16xf32, #tpu.memory_space<vmem>>, vector<8x1x16xf32>
    %342 = vector.shape_cast %341 : vector<8x1x16xf32> to vector<8x16xf32>
    %c0_85 = arith.constant 0 : index
    %c0_86 = arith.constant 0 : index
    %c0_87 = arith.constant 0 : index
    %343 = vector.load %arg4[%c0_85, %c0_86, %c0_87] : memref<1x8x256xf32, #tpu.memory_space<vmem>>, vector<1x8x16xf32>
    %344 = vector.shape_cast %343 : vector<1x8x16xf32> to vector<8x16xf32>
    %345 = vector.shape_cast %342 : vector<8x16xf32> to vector<1x8x16xf32>
    tpu.vector_store %arg4[%c0_85, %c0_86, %c0_87], %345 {strides = array<i32>} : memref<1x8x256xf32, #tpu.memory_space<vmem>>, vector<1x8x16xf32>,
    %c0_88 = arith.constant 0 : index
    %c1_89 = arith.constant 1 : index
    %c0_90 = arith.constant 0 : index
    %346 = vector.load %arg7[%c0_88, %c1_89, %c0_90] : memref<8x16x16xf32, #tpu.memory_space<vmem>>, vector<8x1x16xf32>
    %347 = vector.shape_cast %346 : vector<8x1x16xf32> to vector<8x16xf32>
    %c0_91 = arith.constant 0 : index
    %c0_92 = arith.constant 0 : index
    %c16_93 = arith.constant 16 : index
    %348 = vector.load %arg4[%c0_91, %c0_92, %c16_93] : memref<1x8x256xf32, #tpu.memory_space<vmem>>, vector<1x8x16xf32>
    %349 = vector.shape_cast %348 : vector<1x8x16xf32> to vector<8x16xf32>
    %350 = vector.shape_cast %347 : vector<8x16xf32> to vector<1x8x16xf32>
    tpu.vector_store %arg4[%c0_91, %c0_92, %c16_93], %350 {strides = array<i32>} : memref<1x8x256xf32, #tpu.memory_space<vmem>>, vector<1x8x16xf32>,
    %c0_94 = arith.constant 0 : index
    %c2_95 = arith.constant 2 : index
    %c0_96 = arith.constant 0 : index
    %351 = vector.load %arg7[%c0_94, %c2_95, %c0_96] : memref<8x16x16xf32, #tpu.memory_space<vmem>>, vector<8x1x16xf32>
    %352 = vector.shape_cast %351 : vector<8x1x16xf32> to vector<8x16xf32>
    %c0_97 = arith.constant 0 : index
    %c0_98 = arith.constant 0 : index
    %c32_99 = arith.constant 32 : index
    %353 = vector.load %arg4[%c0_97, %c0_98, %c32_99] : memref<1x8x256xf32, #tpu.memory_space<vmem>>, vector<1x8x16xf32>
    %354 = vector.shape_cast %353 : vector<1x8x16xf32> to vector<8x16xf32>
    %355 = vector.shape_cast %352 : vector<8x16xf32> to vector<1x8x16xf32>
    tpu.vector_store %arg4[%c0_97, %c0_98, %c32_99], %355 {strides = array<i32>} : memref<1x8x256xf32, #tpu.memory_space<vmem>>, vector<1x8x16xf32>,
    %c0_100 = arith.constant 0 : index
    %c3_101 = arith.constant 3 : index
    %c0_102 = arith.constant 0 : index
    %356 = vector.load %arg7[%c0_100, %c3_101, %c0_102] : memref<8x16x16xf32, #tpu.memory_space<vmem>>, vector<8x1x16xf32>
    %357 = vector.shape_cast %356 : vector<8x1x16xf32> to vector<8x16xf32>
    %c0_103 = arith.constant 0 : index
    %c0_104 = arith.constant 0 : index
    %c48 = arith.constant 48 : index
    %358 = vector.load %arg4[%c0_103, %c0_104, %c48] : memref<1x8x256xf32, #tpu.memory_space<vmem>>, vector<1x8x16xf32>
    %359 = vector.shape_cast %358 : vector<1x8x16xf32> to vector<8x16xf32>
    %360 = vector.shape_cast %357 : vector<8x16xf32> to vector<1x8x16xf32>
    tpu.vector_store %arg4[%c0_103, %c0_104, %c48], %360 {strides = array<i32>} : memref<1x8x256xf32, #tpu.memory_space<vmem>>, vector<1x8x16xf32>,
    %c0_105 = arith.constant 0 : index
    %c4_106 = arith.constant 4 : index
    %c0_107 = arith.constant 0 : index
    %361 = vector.load %arg7[%c0_105, %c4_106, %c0_107] : memref<8x16x16xf32, #tpu.memory_space<vmem>>, vector<8x1x16xf32>
    %362 = vector.shape_cast %361 : vector<8x1x16xf32> to vector<8x16xf32>
    %c0_108 = arith.constant 0 : index
    %c0_109 = arith.constant 0 : index
    %c64 = arith.constant 64 : index
    %363 = vector.load %arg4[%c0_108, %c0_109, %c64] : memref<1x8x256xf32, #tpu.memory_space<vmem>>, vector<1x8x16xf32>
    %364 = vector.shape_cast %363 : vector<1x8x16xf32> to vector<8x16xf32>
    %365 = vector.shape_cast %362 : vector<8x16xf32> to vector<1x8x16xf32>
    tpu.vector_store %arg4[%c0_108, %c0_109, %c64], %365 {strides = array<i32>} : memref<1x8x256xf32, #tpu.memory_space<vmem>>, vector<1x8x16xf32>,
    %c0_110 = arith.constant 0 : index
    %c5_111 = arith.constant 5 : index
    %c0_112 = arith.constant 0 : index
    %366 = vector.load %arg7[%c0_110, %c5_111, %c0_112] : memref<8x16x16xf32, #tpu.memory_space<vmem>>, vector<8x1x16xf32>
    %367 = vector.shape_cast %366 : vector<8x1x16xf32> to vector<8x16xf32>
    %c0_113 = arith.constant 0 : index
    %c0_114 = arith.constant 0 : index
    %c80 = arith.constant 80 : index
    %368 = vector.load %arg4[%c0_113, %c0_114, %c80] : memref<1x8x256xf32, #tpu.memory_space<vmem>>, vector<1x8x16xf32>
    %369 = vector.shape_cast %368 : vector<1x8x16xf32> to vector<8x16xf32>
    %370 = vector.shape_cast %367 : vector<8x16xf32> to vector<1x8x16xf32>
    tpu.vector_store %arg4[%c0_113, %c0_114, %c80], %370 {strides = array<i32>} : memref<1x8x256xf32, #tpu.memory_space<vmem>>, vector<1x8x16xf32>,
    %c0_115 = arith.constant 0 : index
    %c6_116 = arith.constant 6 : index
    %c0_117 = arith.constant 0 : index
    %371 = vector.load %arg7[%c0_115, %c6_116, %c0_117] : memref<8x16x16xf32, #tpu.memory_space<vmem>>, vector<8x1x16xf32>
    %372 = vector.shape_cast %371 : vector<8x1x16xf32> to vector<8x16xf32>
    %c0_118 = arith.constant 0 : index
    %c0_119 = arith.constant 0 : index
    %c96 = arith.constant 96 : index
    %373 = vector.load %arg4[%c0_118, %c0_119, %c96] : memref<1x8x256xf32, #tpu.memory_space<vmem>>, vector<1x8x16xf32>
    %374 = vector.shape_cast %373 : vector<1x8x16xf32> to vector<8x16xf32>
    %375 = vector.shape_cast %372 : vector<8x16xf32> to vector<1x8x16xf32>
    tpu.vector_store %arg4[%c0_118, %c0_119, %c96], %375 {strides = array<i32>} : memref<1x8x256xf32, #tpu.memory_space<vmem>>, vector<1x8x16xf32>,
    %c0_120 = arith.constant 0 : index
    %c7_121 = arith.constant 7 : index
    %c0_122 = arith.constant 0 : index
    %376 = vector.load %arg7[%c0_120, %c7_121, %c0_122] : memref<8x16x16xf32, #tpu.memory_space<vmem>>, vector<8x1x16xf32>
    %377 = vector.shape_cast %376 : vector<8x1x16xf32> to vector<8x16xf32>
    %c0_123 = arith.constant 0 : index
    %c0_124 = arith.constant 0 : index
    %c112 = arith.constant 112 : index
    %378 = vector.load %arg4[%c0_123, %c0_124, %c112] : memref<1x8x256xf32, #tpu.memory_space<vmem>>, vector<1x8x16xf32>
    %379 = vector.shape_cast %378 : vector<1x8x16xf32> to vector<8x16xf32>
    %380 = vector.shape_cast %377 : vector<8x16xf32> to vector<1x8x16xf32>
    tpu.vector_store %arg4[%c0_123, %c0_124, %c112], %380 {strides = array<i32>} : memref<1x8x256xf32, #tpu.memory_space<vmem>>, vector<1x8x16xf32>,
    %c0_125 = arith.constant 0 : index
    %c8_126 = arith.constant 8 : index
    %c0_127 = arith.constant 0 : index
    %381 = vector.load %arg7[%c0_125, %c8_126, %c0_127] : memref<8x16x16xf32, #tpu.memory_space<vmem>>, vector<8x1x16xf32>
    %382 = vector.shape_cast %381 : vector<8x1x16xf32> to vector<8x16xf32>
    %c0_128 = arith.constant 0 : index
    %c0_129 = arith.constant 0 : index
    %c128 = arith.constant 128 : index
    %383 = vector.load %arg4[%c0_128, %c0_129, %c128] : memref<1x8x256xf32, #tpu.memory_space<vmem>>, vector<1x8x16xf32>
    %384 = vector.shape_cast %383 : vector<1x8x16xf32> to vector<8x16xf32>
    %385 = vector.shape_cast %382 : vector<8x16xf32> to vector<1x8x16xf32>
    tpu.vector_store %arg4[%c0_128, %c0_129, %c128], %385 {strides = array<i32>} : memref<1x8x256xf32, #tpu.memory_space<vmem>>, vector<1x8x16xf32>,
    %c0_130 = arith.constant 0 : index
    %c9_131 = arith.constant 9 : index
    %c0_132 = arith.constant 0 : index
    %386 = vector.load %arg7[%c0_130, %c9_131, %c0_132] : memref<8x16x16xf32, #tpu.memory_space<vmem>>, vector<8x1x16xf32>
    %387 = vector.shape_cast %386 : vector<8x1x16xf32> to vector<8x16xf32>
    %c0_133 = arith.constant 0 : index
    %c0_134 = arith.constant 0 : index
    %c144 = arith.constant 144 : index
    %388 = vector.load %arg4[%c0_133, %c0_134, %c144] : memref<1x8x256xf32, #tpu.memory_space<vmem>>, vector<1x8x16xf32>
    %389 = vector.shape_cast %388 : vector<1x8x16xf32> to vector<8x16xf32>
    %390 = vector.shape_cast %387 : vector<8x16xf32> to vector<1x8x16xf32>
    tpu.vector_store %arg4[%c0_133, %c0_134, %c144], %390 {strides = array<i32>} : memref<1x8x256xf32, #tpu.memory_space<vmem>>, vector<1x8x16xf32>,
    %c0_135 = arith.constant 0 : index
    %c10_136 = arith.constant 10 : index
    %c0_137 = arith.constant 0 : index
    %391 = vector.load %arg7[%c0_135, %c10_136, %c0_137] : memref<8x16x16xf32, #tpu.memory_space<vmem>>, vector<8x1x16xf32>
    %392 = vector.shape_cast %391 : vector<8x1x16xf32> to vector<8x16xf32>
    %c0_138 = arith.constant 0 : index
    %c0_139 = arith.constant 0 : index
    %c160 = arith.constant 160 : index
    %393 = vector.load %arg4[%c0_138, %c0_139, %c160] : memref<1x8x256xf32, #tpu.memory_space<vmem>>, vector<1x8x16xf32>
    %394 = vector.shape_cast %393 : vector<1x8x16xf32> to vector<8x16xf32>
    %395 = vector.shape_cast %392 : vector<8x16xf32> to vector<1x8x16xf32>
    tpu.vector_store %arg4[%c0_138, %c0_139, %c160], %395 {strides = array<i32>} : memref<1x8x256xf32, #tpu.memory_space<vmem>>, vector<1x8x16xf32>,
    %c0_140 = arith.constant 0 : index
    %c11_141 = arith.constant 11 : index
    %c0_142 = arith.constant 0 : index
    %396 = vector.load %arg7[%c0_140, %c11_141, %c0_142] : memref<8x16x16xf32, #tpu.memory_space<vmem>>, vector<8x1x16xf32>
    %397 = vector.shape_cast %396 : vector<8x1x16xf32> to vector<8x16xf32>
    %c0_143 = arith.constant 0 : index
    %c0_144 = arith.constant 0 : index
    %c176 = arith.constant 176 : index
    %398 = vector.load %arg4[%c0_143, %c0_144, %c176] : memref<1x8x256xf32, #tpu.memory_space<vmem>>, vector<1x8x16xf32>
    %399 = vector.shape_cast %398 : vector<1x8x16xf32> to vector<8x16xf32>
    %400 = vector.shape_cast %397 : vector<8x16xf32> to vector<1x8x16xf32>
    tpu.vector_store %arg4[%c0_143, %c0_144, %c176], %400 {strides = array<i32>} : memref<1x8x256xf32, #tpu.memory_space<vmem>>, vector<1x8x16xf32>,
    %c0_145 = arith.constant 0 : index
    %c12_146 = arith.constant 12 : index
    %c0_147 = arith.constant 0 : index
    %401 = vector.load %arg7[%c0_145, %c12_146, %c0_147] : memref<8x16x16xf32, #tpu.memory_space<vmem>>, vector<8x1x16xf32>
    %402 = vector.shape_cast %401 : vector<8x1x16xf32> to vector<8x16xf32>
    %c0_148 = arith.constant 0 : index
    %c0_149 = arith.constant 0 : index
    %c192 = arith.constant 192 : index
    %403 = vector.load %arg4[%c0_148, %c0_149, %c192] : memref<1x8x256xf32, #tpu.memory_space<vmem>>, vector<1x8x16xf32>
    %404 = vector.shape_cast %403 : vector<1x8x16xf32> to vector<8x16xf32>
    %405 = vector.shape_cast %402 : vector<8x16xf32> to vector<1x8x16xf32>
    tpu.vector_store %arg4[%c0_148, %c0_149, %c192], %405 {strides = array<i32>} : memref<1x8x256xf32, #tpu.memory_space<vmem>>, vector<1x8x16xf32>,
    %c0_150 = arith.constant 0 : index
    %c13_151 = arith.constant 13 : index
    %c0_152 = arith.constant 0 : index
    %406 = vector.load %arg7[%c0_150, %c13_151, %c0_152] : memref<8x16x16xf32, #tpu.memory_space<vmem>>, vector<8x1x16xf32>
    %407 = vector.shape_cast %406 : vector<8x1x16xf32> to vector<8x16xf32>
    %c0_153 = arith.constant 0 : index
    %c0_154 = arith.constant 0 : index
    %c208 = arith.constant 208 : index
    %408 = vector.load %arg4[%c0_153, %c0_154, %c208] : memref<1x8x256xf32, #tpu.memory_space<vmem>>, vector<1x8x16xf32>
    %409 = vector.shape_cast %408 : vector<1x8x16xf32> to vector<8x16xf32>
    %410 = vector.shape_cast %407 : vector<8x16xf32> to vector<1x8x16xf32>
    tpu.vector_store %arg4[%c0_153, %c0_154, %c208], %410 {strides = array<i32>} : memref<1x8x256xf32, #tpu.memory_space<vmem>>, vector<1x8x16xf32>,
    %c0_155 = arith.constant 0 : index
    %c14_156 = arith.constant 14 : index
    %c0_157 = arith.constant 0 : index
    %411 = vector.load %arg7[%c0_155, %c14_156, %c0_157] : memref<8x16x16xf32, #tpu.memory_space<vmem>>, vector<8x1x16xf32>
    %412 = vector.shape_cast %411 : vector<8x1x16xf32> to vector<8x16xf32>
    %c0_158 = arith.constant 0 : index
    %c0_159 = arith.constant 0 : index
    %c224 = arith.constant 224 : index
    %413 = vector.load %arg4[%c0_158, %c0_159, %c224] : memref<1x8x256xf32, #tpu.memory_space<vmem>>, vector<1x8x16xf32>
    %414 = vector.shape_cast %413 : vector<1x8x16xf32> to vector<8x16xf32>
    %415 = vector.shape_cast %412 : vector<8x16xf32> to vector<1x8x16xf32>
    tpu.vector_store %arg4[%c0_158, %c0_159, %c224], %415 {strides = array<i32>} : memref<1x8x256xf32, #tpu.memory_space<vmem>>, vector<1x8x16xf32>,
    %c0_160 = arith.constant 0 : index
    %c15_161 = arith.constant 15 : index
    %c0_162 = arith.constant 0 : index
    %416 = vector.load %arg7[%c0_160, %c15_161, %c0_162] : memref<8x16x16xf32, #tpu.memory_space<vmem>>, vector<8x1x16xf32>
    %417 = vector.shape_cast %416 : vector<8x1x16xf32> to vector<8x16xf32>
    %c0_163 = arith.constant 0 : index
    %c0_164 = arith.constant 0 : index
    %c240 = arith.constant 240 : index
    %418 = vector.load %arg4[%c0_163, %c0_164, %c240] : memref<1x8x256xf32, #tpu.memory_space<vmem>>, vector<1x8x16xf32>
    %419 = vector.shape_cast %418 : vector<1x8x16xf32> to vector<8x16xf32>
    %420 = vector.shape_cast %417 : vector<8x16xf32> to vector<1x8x16xf32>
    tpu.vector_store %arg4[%c0_163, %c0_164, %c240], %420 {strides = array<i32>} : memref<1x8x256xf32, #tpu.memory_space<vmem>>, vector<1x8x16xf32>,
    %c0_165 = arith.constant 0 : index
    %c0_166 = arith.constant 0 : index
    %c0_167 = arith.constant 0 : index
    %421 = vector.load %arg4[%c0_165, %c0_166, %c0_167] : memref<1x8x256xf32, #tpu.memory_space<vmem>>, vector<1x8x256xf32>
    %422 = vector.shape_cast %421 : vector<1x8x256xf32> to vector<8x256xf32>
    %cst_168 = arith.constant dense<0.000000e+00> : vector<8xf32>
    %423 = vector.multi_reduction <add>, %422, %cst_168 [1] : vector<8x256xf32> to vector<8xf32>
    %c0_169 = arith.constant 0 : index
    %c0_170 = arith.constant 0 : index
    %c0_171 = arith.constant 0 : index
    %424 = vector.load %arg5[%c0_169, %c0_170, %c0_171] : memref<1x8x2xf32, #tpu.memory_space<vmem>>, vector<1x8x1xf32>
    %425 = vector.shape_cast %424 : vector<1x8x1xf32> to vector<8xf32>
    %426 = vector.shape_cast %423 : vector<8xf32> to vector<1x8x1xf32>
    tpu.vector_store %arg5[%c0_169, %c0_170, %c0_171], %426 {strides = array<i32>} : memref<1x8x2xf32, #tpu.memory_space<vmem>>, vector<1x8x1xf32>,
    %427 = arith.mulf %422, %422 : vector<8x256xf32>
    %cst_172 = arith.constant dense<0.000000e+00> : vector<8xf32>
    %428 = vector.multi_reduction <add>, %427, %cst_172 [1] : vector<8x256xf32> to vector<8xf32>
    %c0_173 = arith.constant 0 : index
    %c0_174 = arith.constant 0 : index
    %c1_175 = arith.constant 1 : index
    %429 = vector.load %arg5[%c0_173, %c0_174, %c1_175] : memref<1x8x2xf32, #tpu.memory_space<vmem>>, vector<1x8x1xf32>
    %430 = vector.shape_cast %429 : vector<1x8x1xf32> to vector<8xf32>
    %431 = vector.shape_cast %428 : vector<8xf32> to vector<1x8x1xf32>
    tpu.vector_store %arg5[%c0_173, %c0_174, %c1_175], %431 {strides = array<i32>} : memref<1x8x2xf32, #tpu.memory_space<vmem>>, vector<1x8x1xf32>,
    return
  }
  func.func @transform_0(%arg0: i32) -> i32 {
    %c0_i32 = arith.constant 0 : i32
    %c0_i32_0 = arith.constant 0 : i32
    return %c0_i32 : i32
  }
  func.func @transform_1(%arg0: i32) -> i32 {
    %c0_i32 = arith.constant 0 : i32
    %c0_i32_0 = arith.constant 0 : i32
    return %c0_i32 : i32
  }
  func.func @transform_2(%arg0: i32) -> (i32, i32, i32, i32) {
    %c0_i32 = arith.constant 0 : i32
    %c0_i32_0 = arith.constant 0 : i32
    %c0_i32_1 = arith.constant 0 : i32
    %c0_i32_2 = arith.constant 0 : i32
    return %arg0, %c0_i32, %c0_i32_0, %c0_i32_1 : i32, i32, i32, i32
  }
  func.func @transform_3(%arg0: i32) -> (i32, i32, i32) {
    %c0_i32 = arith.constant 0 : i32
    %c0_i32_0 = arith.constant 0 : i32
    %c0_i32_1 = arith.constant 0 : i32
    return %arg0, %c0_i32, %c0_i32_0 : i32, i32, i32
  }
  func.func @transform_4(%arg0: i32) -> (i32, i32, i32) {
    %c0_i32 = arith.constant 0 : i32
    %c0_i32_0 = arith.constant 0 : i32
    %c0_i32_1 = arith.constant 0 : i32
    return %arg0, %c0_i32, %c0_i32_0 : i32, i32, i32
  }
}

</mosaic_0001>

<bundles_post_ra>
// kernel: separable_conv2d.3
= control target key start
LH: loop header
LB: loop body
LE: loop exit
PB: predicated region body
PF: predicated region fallthrough
CT: control target
= control target key end

     0   :  { %s298_s12 = smov 0   ;;  %s321_s0 = inlined_call_operand.vmem [shape: f32[2,8,256], index: 0, kind: input, shape index: {}, may-alias: {0,3}]   ;;  %s322_s1 = inlined_call_operand.vmem [shape: f32[8,1], index: 1, kind: input, shape index: {}]   ;;  %s323_s2 = inlined_call_operand.vmem [shape: f32[8,1], index: 2, kind: input, shape index: {}]   ;;  %s324_s3 = inlined_call_operand.vmem [shape: f32[2,8,256], index: 3, kind: output, shape index: {}, may-alias: {0,3}]  }
   0x1 LB: > { %s246_s13 = sadd.s32 4294967295, %s275_s12   ;;  %p250_p0 = scmp.ge.s32.totalorder %s275_s12, 1  ;;  %s275_s12 = sphi %s298_s12, %s13_s12  }
   0x2   : > { %p137_p1 = scmp.lt.s32.totalorder %s275_s12, 3 }
   0x4   : > { %p138_p2 = pnand %p250_p0, %p137_p1 }
   0x5   : > { %p161_p3 = scmp.lt.s32.totalorder (!%p138_p2), %s246_s13, 1 }
   0x6   : > { %141 = sbr.rel (%p138_p2) target bundleno = 144 (0x90), region = 32 }
   0xb   : > { %v173_v0 = vld [vmem:[%s322_s1] sm:$0xff]  ;;  %v277_v1 = vmov 0   ;;  %s326_s13 = smov (!%p161_p3, %s246_s13), 1 }
   0xc   : > { %268 = vset.pattern.permute.xlu0 %v277_v1  ;;  %v181_v2 = vld [vmem:[%s323_s2] sm:$0xff]  ;;  %s257_s18 = sshll.u32 %s326_s13, 4 }
   0xd   : > { %176 = vperm.xlu0 %268, %v173_v0   ;;  %s165_s21 = scalar_lea.vmem %s321_s0, %s257_s18  ;;  %s170_s24 = scalar_lea.vmem %s324_s3, %s257_s18 }
   0xe   : > { %v171_v4 = vld [vmem:[%s165_s21] sm:$0xff]  ;;  %v172_v5 = vld [vmem:[%s165_s21 + $0x8] sm:$0xff] }
  0x11   : > { %184 = vperm.xlu0 %268, %v181_v2  }
  0x88   : > { %v177_v3 = vpop.permute.xlu0 %176 }
  0x89   : > { %v179_v6 = vmul.f32 %v177_v3, %v171_v4  ;;  %v180_v7 = vmul.f32 %v177_v3, %v172_v5 }
  0x8c   : > { %v185_v8 = vpop.permute.xlu0 %184 }
  0x8d   : > { %v187_v9 = vadd.f32 %v185_v8, %v179_v6  ;;  %v188_v10 = vadd.f32 %v185_v8, %v180_v7 }
  0x8f   : > { %189 = vst [vmem:[%s170_s24] sm:$0xff] %v187_v9  ;;  %190 = vst [vmem:[%s170_s24 + $0x8] sm:$0xff] %v188_v10 }
  0x90 PF: > { %s13_s12 = sadd.s32 1, %s275_s12  }
  0x91   : > { %p10_p4 = scmp.ge.s32.totalorder %s13_s12, 4  }
  0x93   :  { %12 = sbr.rel (!%p10_p4) target bundleno = 1 (0x1), region = 62 }

// kernel: separable_conv2d.2
= control target key start
LH: loop header
LB: loop body
LE: loop exit
PB: predicated region body
PF: predicated region fallthrough
CT: control target
= control target key end

     0   :  { %s3161_s0 = inlined_call_operand.vmem [shape: f32[36], index: 0, kind: input, shape index: {}]   ;;  %s3162_s1 = inlined_call_operand.vmem [shape: f32[32], index: 1, kind: input, shape index: {}]   ;;  %s3163_s2 = inlined_call_operand.hbm [shape: f32[2,4,16,16], index: 2, kind: input, shape index: {}]   ;;  %s3164_s3 = inlined_call_operand.vmem [shape: f32[2,8,256], index: 3, kind: output, shape index: {0}]   ;;  %s3165_s4 = inlined_call_operand.vmem [shape: f32[2,8,2], index: 4, kind: output, shape index: {1}]  }
   0x1   :  { %3171 = sst [smem:[#allocation15_spill]] %s3161_s0 }
   0x2   :  { %3172 = sst [smem:[#allocation16_spill]] %s3162_s1 }
   0x3   :  { %3173 = sst [smem:[#allocation17_spill]] %s3163_s2 }
   0x4   :  { %10 = vsyncpa [#allocation6], 0 }
   0x5   :  { %11 = vsyncpa [#allocation8], 0 }
   0x6   :  { %12 = vsyncpa [#allocation5], 0 }
   0x7   :  { %14 = vsyncpa [#allocation5 + $0x1], 0  ;;  %s2133_s15 = smov 0   ;;  %s2135_s16 = smov 0  }
   0x8   :  { %s2137_s17 = smov 0   ;;  %s2139_s18 = smov 0  }
   0x9 LB: > { %3174 = sst [smem:[#allocation13_spill]] %s2086_s17  ;;  %s2152_s19 = sadd.s32 4294967295, %s2090_s18   ;;  %s2090_s18 = sphi %s2139_s18, %s3195_s18   ;;  %s2086_s17 = sphi %s2137_s17, %s3192_s17   ;;  %s2082_s16 = sphi %s2135_s16, %s3194_s16   ;;  %s2078_s15 = sphi %s2133_s15, %s3193_s15  }
   0xa   : > { %s2155_s20 = sadd.s32 1, %s2090_s18   ;;  %s69_s22 = sadd.s32 1, %s2086_s17 }
   0xb   : > { %s66_s21 = ssub.s32 %s2090_s18, %s2155_s20  ;;  %p76_p1 = scmp.ne.s32.totalorder %s2086_s17, %s2082_s16 }
   0xc   : > { %p67_p0 = scmp.eq.s32.totalorder %s66_s21, 0  ;;  %p77_p2 = scmp.eq.s32.totalorder %s2090_s18, 0 }
   0xd   : > { %p82_p3 = scmp.ne.s32.totalorder %s2082_s16, %s2078_s15  ;;  %p3166_p5 = scmp.eq.s32.totalorder %s2152_s19, 0 }
   0xe   : > { %s2165_s23 = scalar_select %p67_p0, %s2086_s17, %s69_s22  }
   0xf   : > { %p2167_p4 = por %p77_p2, %p76_p1  ;;  %p1833_p6 = scmp.ge.s32.totalorder %s2090_s18, 1 }
  0x10   : > { %3175 = sst [smem:[#allocation14_spill]] %s2165_s23  ;;  %p145_p7 = scmp.lt.s32.totalorder %s2090_s18, 3 }
  0x11   : > { %p2176_p8 = por %p3166_p5, %p82_p3  ;;  %s3179_s0 = sld [smem:[#allocation15_spill]] }
  0x12   : > { %p2180_p9 = pnand %p1833_p6, %p145_p7  ;;  %p1940_p11 = scmp.lt.s32.totalorder %s2090_s18, 2 }
  0x13   : > { %s3177_s25 = scalar_select %p2176_p8, 1, 0 }
  0x14   : > { %s3178_s26 = scalar_select %p2180_p9, 1, 0 }
  0x15   : > { %p1927_p10 = pneg %p2180_p9  ;;  %s3180_s1 = sld [smem:[#allocation16_spill]] }
  0x16   : > { %p2201_p13 = pnand %p1940_p11, %p2167_p4  ;;  %s180_s9 = sand.u32 1, %s2086_s17  }
  0x17   : > { %s158_s29 = sshll.u32 %s3179_s0, 4  ;;  %p2195_p12 = pnand %p1927_p10, %p3166_p5  ;;  %s159_s29 = int_to_ptr.vmem [resolvable:$true] %s158_s29 }
  0x18   : > { %s3182_s8 = scalar_select %p2201_p13, 1, 0 }
  0x19   : > { %s1990_s10 = scalar_lea.vmem %s159_s29, 16  ;;  %p1992_p1 = pneg %p2195_p12 }
  0x1a   : > { %p1991_p0 = scmp.ne.s32.totalorder %s159_s29, %s1990_s10  ;;  %p1998_p6 = scmp.lt.s32.totalorder %s159_s29, %s159_s29 }
  0x1b   : > { %s169_s6 = sshll.u32 %s3180_s1, 4  ;;  %p1999_p7 = scmp.lt.s32.totalorder %s1990_s10, %s1990_s10  ;;  %s170_s6 = int_to_ptr.vmem [resolvable:$true] %s169_s6 }
  0x1c   : > { %p1993_p2 = pnand %p1992_p1, %p1991_p0 }
  0x1d   : > { %p2000_p10 = por %p1999_p7, %p1998_p6 }
  0x1e   : > { %p1994_p3 = pneg %p1993_p2 }
  0x20   : > { %p2001_p5 = pnand %p2000_p10, %p1994_p3 }
  0x22   : > { %2004 = shalt.err (!%p2001_p5)
}
  0x23   : > { %s2092_s11 = smov [#allocation4]   ;;  %s2005_s12 = scalar_lea.vmem %s170_s6, 16 }
  0x24   : > { %1930 = dma.vmem_to_smem (!%p2195_p12), %s159_s29, 16, %s2092_s11, [#allocation6]  }
  0x25   : > { %p2006_p4 = scmp.ne.s32.totalorder %s170_s6, %s2005_s12  ;;  %p2013_p9 = scmp.lt.s32.totalorder %s170_s6, %s170_s6 }
  0x26   : > { %p2014_p13 = scmp.lt.s32.totalorder %s2005_s12, %s2005_s12 }
  0x27   : > { %p2008_p11 = pnand %p2006_p4, %p1992_p1 }
  0x28   : > { %p2015_p0 = por %p2014_p13, %p2013_p9 }
  0x29   : > { %p2009_p8 = pneg %p2008_p11 }
  0x2b   : > { %p2016_p2 = pnand %p2015_p0, %p2009_p8 }
  0x2d   : > { %2019 = shalt.err (!%p2016_p2)
}
  0x2e   : > { %s2093_s13 = smov [#allocation7]   ;;  %s1837_s14 = sshll.u32 %s180_s9, 6 }
  0x2f   : > { %1933 = dma.vmem_to_smem (!%p2195_p12), %s170_s6, 16, %s2093_s13, [#allocation8]  }
  0x30   : > { %s1915_s15 = sshll.u32 %s2090_s18, 10  ;;  %s3183_s2 = sld [smem:[#allocation17_spill]] }
  0x31   : > { %s184_s27 = scalar_lea.vmem [#allocation9], %s1837_s14  ;;  %s2224_s29 = scalar_lea.sflag [#allocation5], %s180_s9 }
  0x32   : > { %s191_s28 = sshll.u32 %s184_s27, 4  ;;  %p3184_p8 = scmp.ne.s32.totalorder %s3182_s8, 0  ;;  %s2220_s28 = int_to_ptr.vmem [resolvable:$true] %s191_s28 }
  0x34   : > { %p2022_p9 = pneg %p3184_p8 }
  0x36   : > { %s2218_s24 = scalar_lea.hbm %s3183_s2, %s1915_s15  ;;  %s2025_s6 = scalar_lea.hbm %s3183_s2, 2048 }
  0x37   : > { %s2020_s30 = scalar_lea.hbm %s2218_s24, 1024  ;;  %p2026_p1 = scmp.lt.s32.totalorder %s2218_s24, %s3183_s2 }
  0x38   : > { %p2021_p5 = scmp.ne.s32.totalorder %s2218_s24, %s2020_s30  ;;  %p2027_p3 = scmp.lt.s32.totalorder %s2025_s6, %s2020_s30 }
  0x3a   : > { %p2023_p12 = pnand %p2022_p9, %p2021_p5  ;;  %p2028_p6 = por %p2027_p3, %p2026_p1 }
  0x3c   : > { %p2024_p13 = pneg %p2023_p12 }
  0x3e   : > { %p2029_p7 = pnand %p2028_p6, %p2024_p13 }
  0x40   : > { %2032 = shalt.err (!%p2029_p7)
}
  0x41   : > { %s2033_s9 = scalar_lea.vmem %s2220_s28, 1024  ;;  %s2094_s11 = smov [#allocation9]  }
  0x42   : > { %p2034_p10 = scmp.ne.s32.totalorder %s2220_s28, %s2033_s9  ;;  %s2038_s12 = sshll.u32 %s2094_s11, 4  ;;  %s2039_s12 = int_to_ptr.vmem [resolvable:$false] %s2038_s12 }
  0x43   : > { %s2040_s13 = scalar_lea.vmem %s2039_s12, 2048  ;;  %p2041_p0 = scmp.lt.s32.totalorder %s2220_s28, %s2039_s12 }
  0x44   : > { %p2036_p4 = pnand %p2034_p10, %p2022_p9  ;;  %p2042_p2 = scmp.lt.s32.totalorder %s2040_s13, %s2033_s9 }
  0x46   : > { %p2037_p11 = pneg %p2036_p4  ;;  %p2043_p5 = por %p2042_p2, %p2041_p0 }
  0x48   : > { %p2044_p12 = pnand %p2043_p5, %p2037_p11 }
  0x4a   : > { %2047 = shalt.err (!%p2044_p12)
}
  0x4b   : > { %s2095_s14 = smov 128   ;;  %s2096_s15 = smov 8  }
  0x4c   : > { %1937 = dma.hbm_to_vmem [thread:$0]  (!%p3184_p8), %s2218_s24, 1024, %s2220_s28, %s2224_s29, %s2095_s14, %s2095_s14, %s2096_s15  }
  0x4d   : > { %p3185_p9 = scmp.ne.s32.totalorder %s3178_s26, 0 }
  0x4e   : > { %p3186_p13 = scmp.eq.s32.totalorder (!%p3185_p9), %s2152_s19, 0 }
  0x4f   : > { %203 = sbr.rel (%p3185_p9) target bundleno = 776 (0x308), region = 32 }
  0x54   : > { %2065 = dma.done.wait (%p3186_p13), [#allocation6], 16   ;;  %p3187_p1 = pmov %p3186_p13 }
  0x56   : > { %2067 = vsyncadd (%p3187_p1), [#allocation6], 4294967280  ;;  %p3188_p3 = pmov %p3187_p1 }
  0x57   : > { %p3189_p6 = pmov %p3187_p1 }
  0x58   : > { %2069 = dma.done.wait (%p3188_p3), [#allocation8], 16  }
  0x59   : > { %2071 = vsyncadd (%p3189_p6), [#allocation8], 4294967280  ;;  %s213_s21 = sand.u32 1, %s2082_s16   ;;  %p3190_p8 = scmp.ne.s32.totalorder %s3177_s25, 0 }
  0x5a   : > { %s1843_s8 = sshll.u32 %s213_s21, 6  ;;  %s214_s22 = scalar_lea.sflag [#allocation5], %s213_s21 }
  0x5b   : > { %s2256_s24 = scalar_lea.vmem [#allocation9], %s1843_s8 }
  0x5c   : > { %2073 = dma.done.wait (%p3190_p8), %s214_s22, 1024  }
  0x5d   : > { %2075 = vsyncadd (%p3190_p8), %s214_s22, 4294966272 }
  0x5e   : > { %222 = sfence }
  0x5f   : > { %v272_v0 = vld [vmem:[%s2256_s24 + $0x10] sm:$0xff]  ;;  %v270_v1 = vld [vmem:[%s2256_s24] sm:$0xff]  ;;  %vm256_vm0 = vcmask 162816   ;;  %s2097_s26 = smov 2   ;;  %vm259_vm1 = vcmask 158720   ;;  %v273_v2 = vld [vmem:[%s2256_s24 + $0x18] sm:$0xff] }
  0x60   : > { %290 = vrot.lane.b32.xlu1 %v272_v0, %s2097_s26  ;;  %286 = vrot.lane.b32.xlu0 %v270_v1, %s2097_s26  ;;  %v271_v3 = vld [vmem:[%s2256_s24 + $0x8] sm:$0xff]  ;;  %v2098_v4 = vmov 0.0   ;;  %v274_v5 = vld [vmem:[%s2256_s24 + $0x20] sm:$0xff]  ;;  %vm310_vm2 = vcmask 146448   ;;  %s2270_s25 = sld [smem:[#allocation4 + $0x4]]  ;;  %s2099_s11 = smov 126  }
  0x61   : > { %261 = vst.msk [vmem:[#allocation2 + $0x18] sm:$0xff] %vm256_vm0, %v2098_v4  ;;  %262 = vst.msk [vmem:[#allocation2 + $0x20] sm:$0xff] %vm256_vm0, %v2098_v4  ;;  %v275_v6 = vld [vmem:[%s2256_s24 + $0x28] sm:$0xff]  ;;  %v276_v7 = vld [vmem:[%s2256_s24 + $0x30] sm:$0xff]  ;;  %s2272_s27 = sld [smem:[#allocation4 + $0x5]]  ;;  %vm424_vm3 = vcmask 1043456  }
  0x62   : > { %257 = vst.msk [vmem:[#allocation2] sm:$0xff] %vm256_vm0, %v2098_v4  ;;  %258 = vst.msk [vmem:[#allocation2 + $0x8] sm:$0xff] %vm256_vm0, %v2098_v4  ;;  %v277_v8 = vld [vmem:[%s2256_s24 + $0x38] sm:$0xff]  ;;  %s2276_s28 = sld [smem:[#allocation4 + $0x8]]  ;;  %vm364_vm4 = vcmask 1045504   ;;  %vm966_vm5 = vcmask 130048  }
  0x63   : > { %264 = vst.msk [vmem:[#allocation2 + $0x30] sm:$0xff] %vm256_vm0, %v2098_v4  ;;  %265 = vst.msk [vmem:[#allocation2 + $0x38] sm:$0xff] %vm256_vm0, %v2098_v4  ;;  %s2278_s29 = sld [smem:[#allocation4 + $0x9]]  ;;  %vm1161_vm6 = vcmask 1041409   ;;  %vm1164_vm7 = vcmask 1042434   ;;  %vm1167_vm8 = vcmask 1043459  }
  0x64   : > { %267 = vst.msk [vmem:[#allocation2 + $0x48] sm:$0xff] %vm256_vm0, %v2098_v4  ;;  %268 = vst.msk [vmem:[#allocation2 + $0x50] sm:$0xff] %vm256_vm0, %v2098_v4  ;;  %292 = vrot.lane.b32.xlu1 %v273_v2, %s2097_s26  ;;  %288 = vrot.lane.b32.xlu0 %v271_v3, %s2097_s26  ;;  %s2280_s30 = sld [smem:[#allocation4 + $0x6]]  ;;  %vm1170_vm9 = vcmask 1044484   ;;  %vm1173_vm10 = vcmask 1045509   ;;  %vm1176_vm11 = vcmask 1046534  }
  0x65   : > { %263 = vst.msk [vmem:[#allocation2 + $0x28] sm:$0xf] %vm259_vm1, %v2098_v4  ;;  %260 = vst.msk [vmem:[#allocation2 + $0x10] sm:$0xf] %vm259_vm1, %v2098_v4  ;;  %s2284_s18 = sld [smem:[#allocation4 + $0x10]]  ;;  %vm1179_vm12 = vcmask 1047559  }
  0x66   : > { %266 = vst.msk [vmem:[#allocation2 + $0x40] sm:$0xf] %vm259_vm1, %v2098_v4  ;;  %269 = vst.msk [vmem:[#allocation2 + $0x58] sm:$0xf] %vm259_vm1, %v2098_v4  ;;  %v329_v13 = vstv %s2270_s25  ;;  %s2287_s5 = sld [smem:[#allocation4 + $0x11]]  ;;  %p247_p7 = scmp.lt.s32.totalorder %s2152_s19, 1 }
  0x67   : > { %s2289_s6 = sld [smem:[#allocation4 + $0x14]]  ;;  %v487_v16 = vstv %s2272_s27  ;;  %vm1216_vm13 = vcmask 261248   ;;  %vm1251_vm14 = vcmask 392448   ;;  %vm1286_vm15 = vcmask 523648  }
  0x68   : > { %294 = vrot.lane.b32.xlu0 %v274_v5, %s2097_s26  ;;  %296 = vrot.lane.b32.xlu1 %v275_v6, %s2097_s26  ;;  %s2296_s7 = sld [smem:[#allocation4 + $0xa]]  ;;  %v343_v26 = vstv %s2276_s28  ;;  %s3197_s19 = smov (!%p247_p7, %s2152_s19), 1  ;;  %vm1321_vm0 = vcmask 654848   ;;  %vm1356_vm1 = vcmask 786048  }
  0x69   : > { %s2301_s10 = sld [smem:[#allocation4 + $0x15]]  ;;  %v501_v29 = vstv %s2278_s29 }
  0x6a   : > { %s2303_s9 = sld [smem:[#allocation4 + $0x1c]]  ;;  %v643_v31 = vstv %s2280_s30 }
  0x6b   : > { %s2307_s12 = sld [smem:[#allocation4 + $0x1d]]  ;;  %v375_v38 = vstv %s2284_s18 }
  0x6c   : > { %298 = vrot.lane.b32.xlu0 %v276_v7, %s2097_s26  ;;  %300 = vrot.lane.b32.xlu1 %v277_v8, %s2097_s26  ;;  %s2311_s13 = sld [smem:[#allocation4 + $0x7]]  ;;  %s2100_s26 = smov 124   ;;  %v532_v39 = vstv %s2287_s5 }
  0x6d   : > { %s2316_s14 = sld [smem:[#allocation4 + $0x20]]  ;;  %v396_v40 = vstv %s2289_s6 }
  0x6e   : > { %s2321_s15 = sld [smem:[#allocation4 + $0x21]]  ;;  %v657_v36 = vstv %s2296_s7 }
  0x6f   : > { %s2325_s21 = sld [smem:[#allocation4 + $0x12]]  ;;  %v553_v42 = vstv %s2301_s10 }
  0x70   : > { %s2327_s8 = sld [smem:[#allocation4 + $0xb]]  ;;  %v2366_v43 = vstv %s2303_s9 }
  0x71   : > { %s2331_s22 = sld [smem:[#allocation4 + $0x16]]  ;;  %v2369_v44 = vstv %s2307_s12 }
  0x72   : > { %s2334_s24 = sld [smem:[#allocation4 + $0xc]]  ;;  %v799_v41 = vstv %s2311_s13 }
  0x73   : > { %s2338_s25 = sld [smem:[#allocation4 + $0x13]]  ;;  %v2376_v47 = vstv %s2316_s14 }
  0x74   : > { %s2343_s27 = sld [smem:[#allocation4 + $0x18]]  ;;  %v2379_v48 = vstv %s2321_s15 }
  0x75   : > { %s2347_s28 = sld [smem:[#allocation4 + $0xd]]  ;;  %v688_v52 = vstv %s2325_s21 }
  0x76   : > { %s2349_s29 = sld [smem:[#allocation4 + $0x19]]  ;;  %v813_v50 = vstv %s2327_s8 }
  0x77   : > { %s2354_s30 = sld [smem:[#allocation4 + $0xe]]  ;;  %v2387_v53 = vstv %s2331_s22 }
  0x78   : > { %v2395_v56 = vstv %s2334_s24  ;;  %s2416_s18 = sld [smem:[#allocation4 + $0x1a]] }
  0x79   : > { %v2392_v55 = vstv %s2338_s25  ;;  %s2449_s5 = sld [smem:[#allocation4 + $0xf]] }
  0x7a   : > { %v2401_v58 = vstv %s2343_s27  ;;  %s2456_s6 = sld [smem:[#allocation4 + $0x1b]] }
  0x7b   : > { %v2398_v57 = vstv %s2347_s28  ;;  %s2604_s7 = sld [smem:[#allocation4 + $0x17]] }
  0x7c   : > { %v2414_v63 = vstv %s2349_s29  ;;  %s1871_s10 = sld [smem:[#allocation4 + $0x1e]] }
  0x7d   : > { %v2429_v4 = vstv %s2354_s30  ;;  %s1872_s9 = sld [smem:[#allocation4 + $0x22]] }
  0x7e   : > { %s1880_s12 = sld [smem:[#allocation4 + $0x1f]] }
  0x7f   : > { %s1881_s13 = sld [smem:[#allocation4 + $0x23]] }
  0x80   : > { %s322_s14 = sld [smem:[#allocation4]] }
  0x81   : > { %s1855_s15 = sld [smem:[#allocation4 + $0x1]] }
  0x82   : > { %s1873_s21 = sld [smem:[#allocation4 + $0x3]] }
  0x83   : > { %s2752_s8 = sld [smem:[#allocation7]] }
  0x84   : > { %s2760_s22 = sld [smem:[#allocation7 + $0x1]] }
  0x85   : > { %s2762_s24 = sld [smem:[#allocation7 + $0x2]] }
  0x86   : > { %s2766_s25 = sld [smem:[#allocation7 + $0x4]] }
  0x87   : > { %s2771_s27 = sld [smem:[#allocation7 + $0x5]] }
  0x88   : > { %s2773_s28 = sld [smem:[#allocation7 + $0x6]] }
  0x89   : > { %s2775_s29 = sld [smem:[#allocation7 + $0x7]] }
  0x8a   : > { %s2777_s30 = sld [smem:[#allocation7 + $0x8]] }
  0x8b   : > { %s2809_s0 = sld [smem:[#allocation7 + $0x15]] }
  0x8c   : > { %s2811_s1 = sld [smem:[#allocation7 + $0x16]] }
  0x8d   : > { %s2815_s2 = sld [smem:[#allocation7 + $0x17]] }
  0x8e   : > { %s2882_s23 = sld [smem:[#allocation7 + $0x1b]] }
  0x8f   : > { %s2884_s17 = sld [smem:[#allocation7 + $0x1c]] }
  0xd2   : > { %v291_v9 = vpop.permute.xlu1 %290  ;;  %v287_v10 = vpop.permute.xlu0 %286 }
  0xd3   : > { %313 = vst.msk [vmem:[#allocation2 + $0x1a] sm:$0xff] %vm310_vm2, %v291_v9  ;;  %311 = vst.msk [vmem:[#allocation2 + $0x2] sm:$0xff] %vm310_vm2, %v287_v10 }
  0xd6   : > { %v293_v11 = vpop.permute.xlu1 %292  ;;  %v289_v12 = vpop.permute.xlu0 %288 }
  0xd7   : > { %314 = vst.msk [vmem:[#allocation2 + $0x22] sm:$0xff] %vm310_vm2, %v293_v11  ;;  %312 = vst.msk [vmem:[#allocation2 + $0xa] sm:$0xff] %vm310_vm2, %v289_v12 }
  0xda   : > { %v2291_v14 = vld [vmem:[#allocation2] sm:$0xff]  ;;  %v2293_v15 = vld [vmem:[#allocation2 + $0x18] sm:$0xff]  ;;  %v295_v17 = vpop.permute.xlu0 %294  ;;  %v297_v18 = vpop.permute.xlu1 %296 }
  0xdb   : > { %v330_v19 = vmul.f32 %v329_v13, %v2291_v14  ;;  %315 = vst.msk [vmem:[#allocation2 + $0x32] sm:$0xff] %vm310_vm2, %v295_v17  ;;  %316 = vst.msk [vmem:[#allocation2 + $0x3a] sm:$0xff] %vm310_vm2, %v297_v18  ;;  %v488_v20 = vmul.f32 %v487_v16, %v2293_v15  ;;  %v344_v28 = vmul.f32 %v343_v26, %v2291_v14 }
  0xdc   : > { %v502_v33 = vmul.f32 %v501_v29, %v2293_v15  ;;  %v376_v51 = vmul.f32 %v375_v38, %v2291_v14  ;;  %v2407_v60 = vmul.f32 %v532_v39, %v2293_v15  ;;  %v613_v62 = vmul.f32 %v2379_v48, %v2293_v15 }
  0xdd   : > { %334 = vrot.lane.b32.xlu0 %v330_v19, %s2099_s11  ;;  %v2424_v2 = vmul.f32 %v396_v40, %v2291_v14  ;;  %v457_v3 = vmul.f32 %v2376_v47, %v2291_v14  ;;  %v554_v8 = vmul.f32 %v553_v42, %v2293_v15 }
  0xde   : > { %v2309_v21 = vld [vmem:[#allocation2 + $0x8] sm:$0xff]  ;;  %v299_v22 = vpop.permute.xlu0 %298  ;;  %v301_v23 = vpop.permute.xlu1 %300  ;;  %v2318_v25 = vld [vmem:[#allocation2 + $0x20] sm:$0xff]  ;;  %v2389_v54 = vld [vmem:[#allocation2 + $0x10] sm:$0xf]  ;;  %v382_v5 = vrot.slane %v376_v51, 2  ;;  %v619_v19 = vrot.slane %v613_v62, 4 }
  0xdf   : > { %v331_v24 = vmul.f32 %v329_v13, %v2309_v21  ;;  %317 = vst.msk [vmem:[#allocation2 + $0x4a] sm:$0xff] %vm310_vm2, %v299_v22  ;;  %318 = vst.msk [vmem:[#allocation2 + $0x52] sm:$0xff] %vm310_vm2, %v301_v23  ;;  %v489_v27 = vmul.f32 %v487_v16, %v2318_v25  ;;  %v345_v32 = vmul.f32 %v343_v26, %v2309_v21  ;;  %v2409_v61 = vld [vmem:[#allocation2 + $0x28] sm:$0xf]  ;;  %v463_v22 = vrot.slane %v457_v3, 4 }
  0xe0   : > { %v503_v37 = vmul.f32 %v501_v29, %v2318_v25  ;;  %v2404_v59 = vmul.f32 %v375_v38, %v2309_v21  ;;  %v378_v6 = vmul.f32 %v375_v38, %v2389_v54  ;;  %v534_v7 = vmul.f32 %v532_v39, %v2318_v25 }
  0xe1   : > { %336 = vrot.lane.b32.xlu1 %v331_v24, %s2099_s11  ;;  %492 = vrot.lane.b32.xlu0 %v488_v20, %s2099_s11  ;;  %v535_v10 = vmul.f32 %v532_v39, %v2409_v61  ;;  %v2438_v11 = vmul.f32 %v2376_v47, %v2309_v21  ;;  %v2442_v12 = vmul.f32 %v2379_v48, %v2318_v25  ;;  %v403_v38 = vrot.slane %v2424_v2, 2 }
  0xe2   : > { %v2340_v30 = vld [vmem:[#allocation2 + $0x30] sm:$0xff]  ;;  %v2356_v35 = vld [vmem:[#allocation2 + $0x38] sm:$0xff]  ;;  %v383_v16 = vrot.slane %v2404_v59, 2  ;;  %v398_v17 = vmul.f32 %v396_v40, %v2309_v21  ;;  %v2447_v18 = vld [vmem:[#allocation2 + $0x40] sm:$0xf]  ;;  %v399_v26 = vmul.f32 %v396_v40, %v2389_v54  ;;  %v2477_v39 = vstv %s2416_s18  ;;  %s2779_s18 = sld [smem:[#allocation7 + $0x9]] }
  0xe3   : > { %v644_v34 = vmul.f32 %v643_v31, %v2340_v30  ;;  %v645_v45 = vmul.f32 %v643_v31, %v2356_v35  ;;  %v658_v46 = vmul.f32 %v657_v36, %v2340_v30  ;;  %v659_v9 = vmul.f32 %v657_v36, %v2356_v35 }
  0xe4   : > { %v464_v23 = vrot.slane %v2438_v11, 4  ;;  %v620_v24 = vrot.slane %v2442_v12, 4  ;;  %v689_v29 = vmul.f32 %v688_v52, %v2340_v30  ;;  %v690_v31 = vmul.f32 %v688_v52, %v2356_v35 }
  0xe5   : > { %494 = vrot.lane.b32.xlu1 %v489_v27, %s2099_s11  ;;  %348 = vrot.lane.b32.xlu0 %v344_v28, %s2100_s26  ;;  %v555_v27 = vmul.f32 %v553_v42, %v2318_v25  ;;  %v556_v28 = vmul.f32 %v553_v42, %v2409_v61  ;;  %v385_v36 = vrot.slane %v378_v6, 2  ;;  %v384_v40 = vsel %vm364_vm4, %v382_v5, %v383_v16 }
  0xe6   : > { %v2381_v49 = vld [vmem:[#allocation2 + $0x48] sm:$0xff]  ;;  %v2421_v1 = vld [vmem:[#allocation2 + $0x50] sm:$0xff]  ;;  %v542_v42 = vrot.slane %v535_v10, 2  ;;  %v406_v51 = vrot.slane %v399_v26, 2  ;;  %v695_v62 = vrot.slane %v689_v29, 2  ;;  %v2485_v3 = vmul.f32 %v2387_v53, %v2340_v30 }
  0xe7   : > { %v800_v0 = vmul.f32 %v799_v41, %v2381_v49  ;;  %v801_v13 = vmul.f32 %v799_v41, %v2421_v1  ;;  %v814_v20 = vmul.f32 %v813_v50, %v2381_v49  ;;  %v540_v41 = vrot.slane %v534_v7, 2 }
  0xe8   : > { %v561_v59 = vrot.slane %v555_v27, 2  ;;  %v2489_v5 = vmul.f32 %v2387_v53, %v2356_v35  ;;  %v2497_v6 = vmul.f32 %v2392_v55, %v2381_v49  ;;  %v386_v7 = vsel %vm364_vm4, %v383_v16, %v385_v36 }
  0xe9   : > { %350 = vrot.lane.b32.xlu1 %v345_v32, %s2100_s26  ;;  %506 = vrot.lane.b32.xlu0 %v502_v33, %s2100_s26  ;;  %v691_v32 = vmul.f32 %v688_v52, %v2447_v18  ;;  %v2467_v33 = vsel %vm424_vm3, %v463_v22, %v464_v23  ;;  %v560_v52 = vrot.slane %v554_v8, 2  ;;  %v2504_v8 = vmul.f32 %v2392_v55, %v2421_v1 }
  0xea   : > { %v2508_v10 = vstv %s2456_s6  ;;  %v717_v29 = vrot.slane %v2489_v5, 2  ;;  %s2786_s6 = sld [smem:[#allocation7 + $0xb]]  ;;  %vm1391_vm2 = vcmask 917248  }
  0xeb   : > { %v698_v2 = vrot.slane %v691_v32, 2  ;;  %v562_v22 = vsel %vm364_vm4, %v560_v52, %v561_v59  ;;  %v851_v32 = vrot.slane %v2497_v6, 2  ;;  %v852_v36 = vrot.slane %v2504_v8, 2 }
  0xec   : > { %v672_v52 = vmul.f32 %v2429_v4, %v2340_v30  ;;  %v594_v6 = vmul.f32 %v2369_v44, %v2409_v61 }
  0xed   : > { %508 = vrot.lane.b32.xlu1 %v503_v37, %s2100_s26  ;;  %648 = vrot.lane.b32.xlu0 %v644_v34, %s2099_s11  ;;  %v2472_v34 = vsel %vm424_vm3, %v619_v19, %v620_v24  ;;  %v539_v37 = vrot.slane %v2407_v60, 2  ;;  %v563_v60 = vrot.slane %v556_v28, 2  ;;  %v716_v28 = vrot.slane %v2485_v3, 2 }
  0xee   : > { %v436_v3 = vmul.f32 %v2366_v43, %v2291_v14 }
  0xef   : > { %v564_v16 = vsel %vm364_vm4, %v561_v59, %v563_v60  ;;  %v673_v59 = vmul.f32 %v2429_v4, %v2356_v35 }
  0xf1   : > { %650 = vrot.lane.b32.xlu1 %v645_v45, %s2099_s11  ;;  %662 = vrot.lane.b32.xlu0 %v658_v46, %s2100_s26  ;;  %v404_v45 = vrot.slane %v398_v17, 2  ;;  %v815_v46 = vmul.f32 %v813_v50, %v2421_v1  ;;  %v2493_v50 = vmul.f32 %v2387_v53, %v2447_v18  ;;  %v541_v53 = vsel %vm364_vm4, %v539_v37, %v540_v41 }
  0xf3   : > { %v405_v17 = vsel %vm364_vm4, %v403_v38, %v404_v45  ;;  %v407_v19 = vsel %vm364_vm4, %v404_v45, %v406_v51  ;;  %v358_v38 = vmul.f32 %v2395_v56, %v2291_v14  ;;  %v517_v45 = vmul.f32 %v2398_v57, %v2318_v25 }
  0xf5   : > { %664 = vrot.lane.b32.xlu1 %v659_v9, %s2100_s26  ;;  %804 = vrot.lane.b32.xlu0 %v800_v0, %s2099_s11  ;;  %v696_v0 = vrot.slane %v690_v31, 2  ;;  %v827_v9 = vstv %s2449_s5  ;;  %v719_v31 = vrot.slane %v2493_v50, 2  ;;  %s2784_s5 = sld [smem:[#allocation7 + $0xa]] }
  0xf7   : > { %v697_v26 = vsel %vm364_vm4, %v695_v62, %v696_v0  ;;  %v2520_v27 = vsel %vm364_vm4, %v696_v0, %v698_v2 }
  0xf9   : > { %806 = vrot.lane.b32.xlu1 %v801_v13, %s2099_s11  ;;  %818 = vrot.lane.b32.xlu0 %v814_v20, %s2100_s26  ;;  %v543_v13 = vsel %vm364_vm4, %v540_v41, %v542_v42  ;;  %v2514_v20 = vld [vmem:[#allocation2 + $0x58] sm:$0xf]  ;;  %v360_v41 = vmul.f32 %v2395_v56, %v2389_v54  ;;  %v516_v42 = vmul.f32 %v2398_v57, %v2293_v15 }
  0xfa   : > { %v2531_v37 = vmul.f32 %v2392_v55, %v2514_v20  ;;  %v365_v55 = vrot.slane %v358_v38, 2 }
  0xfb   : > { %v368_v60 = vrot.slane %v360_v41, 2  ;;  %v522_v62 = vrot.slane %v516_v42, 2 }
  0xfd   : > { %820 = vrot.lane.b32.xlu1 %v815_v46, %s2100_s26  ;;  %387 = vrot.lane.b32.xlu0 %v384_v40, %s2099_s11  ;;  %v359_v40 = vmul.f32 %v2395_v56, %v2309_v21  ;;  %v518_v46 = vmul.f32 %v2398_v57, %v2409_v61  ;;  %v523_v56 = vrot.slane %v517_v45, 2  ;;  %v678_v57 = vrot.slane %v672_v52, 2 }
  0xfe   : > { %v829_v45 = vmul.f32 %v827_v9, %v2421_v1  ;;  %v420_v52 = vmul.f32 %v2401_v58, %v2389_v54 }
  0xff   : > { %v366_v51 = vrot.slane %v359_v40, 2  ;;  %v525_v0 = vrot.slane %v518_v46, 2  ;;  %v2560_v40 = vsel %vm364_vm4, %v522_v62, %v523_v56  ;;  %v830_v46 = vmul.f32 %v827_v9, %v2514_v20 }
 0x101   : > { %389 = vrot.lane.b32.xlu1 %v386_v7, %s2099_s11  ;;  %544 = vrot.lane.b32.xlu0 %v541_v53, %s2099_s11  ;;  %v2552_v2 = vsel %vm364_vm4, %v365_v55, %v366_v51  ;;  %v679_v7 = vrot.slane %v673_v59, 2  ;;  %v674_v53 = vmul.f32 %v2429_v4, %v2447_v18  ;;  %v2557_v38 = vsel %vm364_vm4, %v366_v51, %v368_v60 }
 0x102   : > { %v2563_v41 = vsel %vm364_vm4, %v523_v56, %v525_v0  ;;  %v418_v55 = vmul.f32 %v2401_v58, %v2291_v14  ;;  %v419_v51 = vmul.f32 %v2401_v58, %v2309_v21  ;;  %v835_v60 = vrot.slane %v829_v45, 2 }
 0x103   : > { %v681_v42 = vrot.slane %v674_v53, 2  ;;  %v837_v62 = vrot.slane %v830_v46, 2  ;;  %v576_v53 = vmul.f32 %v2414_v63, %v2318_v25  ;;  %v731_v46 = vmul.f32 %v2477_v39, %v2340_v30 }
 0x104   : > { %v425_v56 = vrot.slane %v418_v55, 4  ;;  %v426_v0 = vrot.slane %v419_v51, 4  ;;  %v733_v55 = vmul.f32 %v2477_v39, %v2447_v18  ;;  %v887_v51 = vmul.f32 %v2508_v10, %v2381_v49 }
 0x105   : > { %546 = vrot.lane.b32.xlu1 %v543_v13, %s2099_s11  ;;  %408 = vrot.lane.b32.xlu0 %v405_v17, %s2100_s26  ;;  %v828_v13 = vmul.f32 %v827_v9, %v2381_v49  ;;  %v2567_v17 = vsel %vm364_vm4, %v678_v57, %v679_v7  ;;  %v2580_v59 = vsel %vm364_vm4, %v679_v7, %v681_v42  ;;  %v428_v57 = vrot.slane %v420_v52, 4 }
 0x106   : > { %v575_v9 = vmul.f32 %v2414_v63, %v2293_v15  ;;  %v577_v7 = vmul.f32 %v2414_v63, %v2409_v61  ;;  %v582_v45 = vrot.slane %v576_v53, 4  ;;  %v732_v63 = vmul.f32 %v2477_v39, %v2356_v35 }
 0x107   : > { %v834_v4 = vrot.slane %v828_v13, 2  ;;  %v2595_v13 = vsel %vm424_vm3, %v425_v56, %v426_v0  ;;  %v2598_v42 = vsel %vm424_vm3, %v426_v0, %v428_v57  ;;  %v740_v56 = vrot.slane %v733_v55, 4 }
 0x108   : > { %v893_v0 = vrot.slane %v887_v51, 4  ;;  %v718_v39 = vsel %vm364_vm4, %v716_v28, %v717_v29  ;;  %v437_v57 = vmul.f32 %v2366_v43, %v2309_v21  ;;  %v720_v55 = vsel %vm364_vm4, %v717_v29, %v719_v31 }
 0x109   : > { %410 = vrot.lane.b32.xlu1 %v407_v19, %s2100_s26  ;;  %565 = vrot.lane.b32.xlu0 %v562_v22, %s2100_s26  ;;  %v2587_v58 = vsel %vm364_vm4, %v834_v4, %v835_v60  ;;  %v2590_v19 = vsel %vm364_vm4, %v835_v60, %v837_v62  ;;  %v581_v22 = vrot.slane %v575_v9, 4  ;;  %v584_v4 = vrot.slane %v577_v7, 4 }
 0x10a   : > { %v737_v60 = vrot.slane %v731_v46, 4  ;;  %v738_v9 = vrot.slane %v732_v63, 4  ;;  %v438_v46 = vmul.f32 %v2366_v43, %v2389_v54  ;;  %v593_v63 = vmul.f32 %v2369_v44, %v2318_v25 }
 0x10b   : > { %v2613_v52 = vsel %vm424_vm3, %v581_v22, %v582_v45  ;;  %v2620_v62 = vsel %vm424_vm3, %v582_v45, %v584_v4  ;;  %v592_v4 = vmul.f32 %v2369_v44, %v2293_v15  ;;  %v443_v51 = vrot.slane %v437_v57, 4 }
 0x10c   : > { %v2636_v7 = vsel %vm424_vm3, %v738_v9, %v740_v56  ;;  %v865_v43 = vstv %s2604_s7  ;;  %v445_v5 = vrot.slane %v438_v46, 4  ;;  %v599_v29 = vrot.slane %v593_v63, 4  ;;  %s2788_s7 = sld [smem:[#allocation7 + $0xc]] }
 0x10d   : > { %567 = vrot.lane.b32.xlu1 %v564_v16, %s2100_s26  ;;  %700 = vrot.lane.b32.xlu0 %v697_v26, %s2099_s11  ;;  %v888_v16 = vmul.f32 %v2508_v10, %v2421_v1  ;;  %v889_v26 = vmul.f32 %v2508_v10, %v2514_v20  ;;  %v2633_v10 = vsel %vm424_vm3, %v737_v60, %v738_v9  ;;  %v442_v60 = vrot.slane %v436_v3, 4 }
 0x10e   : > { %v446_v8 = vsel %vm424_vm3, %v443_v51, %v445_v5  ;;  %v601_v9 = vrot.slane %v594_v6, 4  ;;  %v459_v44 = vmul.f32 %v2376_v47, %v2389_v54  ;;  %v747_v3 = vstv %s1871_s10  ;;  %s2790_s10 = sld [smem:[#allocation7 + $0xd]] }
 0x10f   : > { %v894_v53 = vrot.slane %v888_v16, 4  ;;  %v896_v22 = vrot.slane %v889_v26, 4  ;;  %v598_v16 = vrot.slane %v592_v4, 4  ;;  %v444_v31 = vsel %vm424_vm3, %v442_v60, %v443_v51 }
 0x110   : > { %v867_v26 = vmul.f32 %v865_v43, %v2421_v1  ;;  %v602_v57 = vsel %vm424_vm3, %v599_v29, %v601_v9  ;;  %v615_v46 = vmul.f32 %v2379_v48, %v2409_v61  ;;  %v748_v63 = vmul.f32 %v747_v3, %v2340_v30 }
 0x111   : > { %702 = vrot.lane.b32.xlu1 %v2520_v27, %s2099_s11  ;;  %721 = vrot.lane.b32.xlu0 %v718_v39, %s2100_s26  ;;  %v2641_v28 = vsel %vm424_vm3, %v893_v0, %v894_v53  ;;  %v2644_v45 = vsel %vm424_vm3, %v894_v53, %v896_v22  ;;  %v854_v27 = vrot.slane %v2531_v37, 2  ;;  %v853_v37 = vsel %vm364_vm4, %v851_v32, %v852_v36 }
 0x112   : > { %v866_v32 = vmul.f32 %v865_v43, %v2381_v49  ;;  %v873_v0 = vrot.slane %v867_v26, 2  ;;  %v868_v39 = vmul.f32 %v865_v43, %v2514_v20  ;;  %v749_v47 = vmul.f32 %v747_v3, %v2356_v35 }
 0x113   : > { %v855_v50 = vsel %vm364_vm4, %v852_v36, %v854_v27  ;;  %v600_v36 = vsel %vm424_vm3, %v598_v16, %v599_v29  ;;  %v466_v27 = vrot.slane %v459_v44, 4  ;;  %v768_v54 = vstv %s1872_s9  ;;  %s2795_s9 = sld [smem:[#allocation7 + $0xe]] }
 0x114   : > { %v872_v56 = vrot.slane %v866_v32, 2  ;;  %v875_v22 = vrot.slane %v868_v39, 2  ;;  %v750_v48 = vmul.f32 %v747_v3, %v2447_v18  ;;  %v903_v61 = vstv %s1880_s12  ;;  %s2797_s12 = sld [smem:[#allocation7 + $0xf]] }
 0x115   : > { %723 = vrot.lane.b32.xlu1 %v720_v55, %s2100_s26  ;;  %856 = vrot.lane.b32.xlu0 %v853_v37, %s2099_s11  ;;  %v467_v55 = vsel %vm424_vm3, %v464_v23, %v466_v27  ;;  %v622_v37 = vrot.slane %v615_v46, 4  ;;  %v754_v51 = vrot.slane %v748_v63, 4  ;;  %v755_v43 = vrot.slane %v749_v47, 4 }
 0x116   : > { %v874_v53 = vsel %vm364_vm4, %v872_v56, %v873_v0  ;;  %v876_v4 = vsel %vm364_vm4, %v873_v0, %v875_v22  ;;  %v769_v60 = vmul.f32 %v768_v54, %v2340_v30  ;;  %v757_v23 = vrot.slane %v750_v48, 4 }
 0x117   : > { %v623_v11 = vsel %vm424_vm3, %v620_v24, %v622_v37  ;;  %v904_v5 = vmul.f32 %v903_v61, %v2381_v49  ;;  %v756_v16 = vsel %vm424_vm3, %v754_v51, %v755_v43  ;;  %v905_v6 = vmul.f32 %v903_v61, %v2421_v1 }
 0x118   : > { %v775_v29 = vrot.slane %v769_v60, 4  ;;  %v758_v12 = vsel %vm424_vm3, %v755_v43, %v757_v23  ;;  %v906_v26 = vmul.f32 %v903_v61, %v2514_v20  ;;  %v481_v47 = vstv %s1855_s15  ;;  %s2803_s15 = sld [smem:[#allocation7 + $0x12]] }
 0x119   : > { %858 = vrot.lane.b32.xlu1 %v855_v50, %s2099_s11  ;;  %447 = vrot.lane.b32.xlu0 %v444_v31, %s2099_s11  ;;  %v770_v50 = vmul.f32 %v768_v54, %v2356_v35  ;;  %v910_v24 = vrot.slane %v904_v5, 4  ;;  %v482_v37 = vmul.f32 %v481_v47, %v2293_v15  ;;  %v483_v60 = vmul.f32 %v481_v47, %v2318_v25 }
 0x11a   : > { %v913_v0 = vrot.slane %v906_v26, 4  ;;  %vm1703_vm4 = vcmask 7168  }
 0x11b   : > { %v776_v31 = vrot.slane %v770_v50, 4 }
 0x11d   : > { %449 = vrot.lane.b32.xlu1 %v446_v8, %s2099_s11  ;;  %603 = vrot.lane.b32.xlu0 %v600_v36, %s2099_s11  ;;  %v911_v8 = vrot.slane %v905_v6, 4 }
 0x11f   : > { %v912_v39 = vsel %vm424_vm3, %v910_v24, %v911_v8  ;;  %v914_v22 = vsel %vm424_vm3, %v911_v8, %v913_v0 }
 0x121   : > { %605 = vrot.lane.b32.xlu1 %v602_v57, %s2099_s11  ;;  %877 = vrot.lane.b32.xlu0 %v874_v53, %s2100_s26 }
 0x125   : > { %879 = vrot.lane.b32.xlu1 %v876_v4, %s2100_s26  ;;  %468 = vrot.lane.b32.xlu0 %v2467_v33, %s2100_s26  ;;  %v771_v33 = vmul.f32 %v768_v54, %v2447_v18  ;;  %v777_v18 = vsel %vm424_vm3, %v775_v29, %v776_v31 }
 0x127   : > { %v778_v32 = vrot.slane %v771_v33, 4 }
 0x129   : > { %470 = vrot.lane.b32.xlu1 %v467_v55, %s2100_s26  ;;  %624 = vrot.lane.b32.xlu0 %v2472_v34, %s2100_s26  ;;  %v924_v34 = vstv %s1881_s13  ;;  %v779_v56 = vsel %vm424_vm3, %v776_v31, %v778_v32  ;;  %s2799_s13 = sld [smem:[#allocation7 + $0x10]] }
 0x12a   : > { %v925_v36 = vmul.f32 %v924_v34, %v2381_v49  ;;  %v926_v9 = vmul.f32 %v924_v34, %v2421_v1  ;;  %v927_v53 = vmul.f32 %v924_v34, %v2514_v20  ;;  %v323_v20 = vstv %s322_s14  ;;  %s2801_s14 = sld [smem:[#allocation7 + $0x11]] }
 0x12b   : > { %v324_v4 = vmul.f32 %v323_v20, %v2291_v14  ;;  %v325_v55 = vmul.f32 %v323_v20, %v2309_v21 }
 0x12c   : > { %v931_v44 = vrot.slane %v925_v36, 4  ;;  %v932_v57 = vrot.slane %v926_v9, 4  ;;  %v934_v27 = vrot.slane %v927_v53, 4  ;;  %v793_v9 = vstv %s1873_s21  ;;  %s2807_s21 = sld [smem:[#allocation7 + $0x14]] }
 0x12d   : > { %626 = vrot.lane.b32.xlu1 %v623_v11, %s2100_s26  ;;  %759 = vrot.lane.b32.xlu0 %v756_v16, %s2099_s11 }
 0x12e   : > { %v933_v3 = vsel %vm424_vm3, %v931_v44, %v932_v57  ;;  %v935_v46 = vsel %vm424_vm3, %v932_v57, %v934_v27  ;;  %v794_v44 = vmul.f32 %v793_v9, %v2381_v49  ;;  %vm1426_vm3 = vcmask 1048448  }
 0x131   : > { %761 = vrot.lane.b32.xlu1 %v758_v12, %s2099_s11  ;;  %780 = vrot.lane.b32.xlu0 %v777_v18, %s2100_s26 }
 0x135   : > { %782 = vrot.lane.b32.xlu1 %v779_v56, %s2100_s26  ;;  %915 = vrot.lane.b32.xlu0 %v912_v39, %s2099_s11 }
 0x139   : > { %917 = vrot.lane.b32.xlu1 %v914_v22, %s2099_s11  ;;  %936 = vrot.lane.b32.xlu0 %v933_v3, %s2100_s26  ;;  %s1864_s11 = sld [smem:[#allocation4 + $0x2]] }
 0x13d   : > { %938 = vrot.lane.b32.xlu1 %v935_v46, %s2100_s26  ;;  %s2764_s26 = sld [smem:[#allocation7 + $0x3]] }
 0x13f   : > { %v637_v21 = vstv %s1864_s11  ;;  %s2805_s11 = sld [smem:[#allocation7 + $0x13]] }
 0x140   : > { %v638_v25 = vmul.f32 %v637_v21, %v2340_v30  ;;  %v639_v8 = vmul.f32 %v637_v21, %v2356_v35 }
 0x14f   : > { %v335_v63 = vpop.permute.xlu0 %334 }
 0x150   : > { %v340_v54 = vadd.f32 %v335_v63, %v324_v4 }
 0x153   : > { %v337_v48 = vpop.permute.xlu1 %336  ;;  %v493_v61 = vpop.permute.xlu0 %492 }
 0x154   : > { %v341_v51 = vadd.f32 %v337_v48, %v325_v55  ;;  %v498_v43 = vadd.f32 %v493_v61, %v482_v37 }
 0x157   : > { %v495_v50 = vpop.permute.xlu1 %494  ;;  %v349_v11 = vpop.permute.xlu0 %348 }
 0x158   : > { %v499_v23 = vadd.f32 %v495_v50, %v483_v60  ;;  %v354_v33 = vadd.f32 %v349_v11, %v340_v54 }
 0x15a   : > { %v372_v14 = vadd.f32 %v2552_v2, %v354_v33 }
 0x15b   : > { %v351_v5 = vpop.permute.xlu1 %350  ;;  %v507_v16 = vpop.permute.xlu0 %506 }
 0x15c   : > { %v355_v29 = vadd.f32 %v351_v5, %v341_v51  ;;  %v512_v31 = vadd.f32 %v507_v16, %v498_v43 }
 0x15e   : > { %v373_v15 = vadd.f32 %v2557_v38, %v355_v29  ;;  %v529_v6 = vadd.f32 %v2560_v40, %v512_v31 }
 0x15f   : > { %v509_v34 = vpop.permute.xlu1 %508  ;;  %v649_v12 = vpop.permute.xlu0 %648 }
 0x160   : > { %v513_v32 = vadd.f32 %v509_v34, %v499_v23  ;;  %v654_v24 = vadd.f32 %v649_v12, %v638_v25 }
 0x162   : > { %v530_v26 = vadd.f32 %v2563_v41, %v513_v32  ;;  %v795_v41 = vmul.f32 %v793_v9, %v2421_v1  ;;  %v1070_v9 = vstv %s2771_s27  ;;  %s2932_s27 = sld [smem:[#allocation7 + $0x1f]] }
 0x163   : > { %v651_v18 = vpop.permute.xlu1 %650  ;;  %v663_v2 = vpop.permute.xlu0 %662 }
 0x164   : > { %v668_v36 = vadd.f32 %v663_v2, %v654_v24  ;;  %v655_v56 = vadd.f32 %v651_v18, %v639_v8  ;;  %v970_v18 = vstv %s2760_s22  ;;  %v995_v2 = vstv %s2762_s24  ;;  %s2870_s22 = sld [smem:[#allocation7 + $0x19]] }
 0x165   : > { %v1020_v8 = vstv %s2764_s26  ;;  %s2880_s24 = sld [smem:[#allocation7 + $0x1a]] }
 0x166   : > { %v685_v0 = vadd.f32 %v2567_v17, %v668_v36  ;;  %v1045_v36 = vstv %s2766_s25  ;;  %s2917_s26 = sld [smem:[#allocation7 + $0x1d]] }
 0x167   : > { %v665_v38 = vpop.permute.xlu1 %664  ;;  %v805_v39 = vpop.permute.xlu0 %804  ;;  %s2922_s25 = sld [smem:[#allocation7 + $0x1e]] }
 0x168   : > { %v669_v40 = vadd.f32 %v665_v38, %v655_v56  ;;  %v810_v57 = vadd.f32 %v805_v39, %v794_v44  ;;  %v1120_v38 = vstv %s2775_s29  ;;  %s2107_s29 = smov 112  }
 0x16a   : > { %v686_v30 = vadd.f32 %v2580_v59, %v669_v40 }
 0x16b   : > { %v807_v53 = vpop.permute.xlu1 %806  ;;  %v819_v22 = vpop.permute.xlu0 %818 }
 0x16c   : > { %v824_v3 = vadd.f32 %v819_v22, %v810_v57  ;;  %v811_v27 = vadd.f32 %v807_v53, %v795_v41  ;;  %v974_v53 = vstv %s2779_s18  ;;  %v999_v22 = vstv %s2784_s5 }
 0x16e   : > { %v841_v35 = vadd.f32 %v2587_v58, %v824_v3  ;;  %v1024_v3 = vstv %s2786_s6 }
 0x16f   : > { %v821_v46 = vpop.permute.xlu1 %820  ;;  %v388_v20 = vpop.permute.xlu0 %387 }
 0x170   : > { %v825_v4 = vadd.f32 %v821_v46, %v811_v27  ;;  %v393_v49 = vadd.f32 %v388_v20, %v372_v14  ;;  %v1049_v27 = vstv %s2788_s7  ;;  %v1124_v20 = vstv %s2797_s12  ;;  %s1846_s7 = sshll.u32 %s3197_s19, 3 }
 0x171   : > { %s255_s12 = scalar_lea.vmem %s3165_s4, %s1846_s7 }
 0x172   : > { %v2747_v17 = vadd.f32 %v2590_v19, %v825_v4  ;;  %v955_v4 = vstv %s2799_s13 }
 0x173   : > { %v390_v63 = vpop.permute.xlu1 %389  ;;  %v545_v47 = vpop.permute.xlu0 %544 }
 0x174   : > { %v394_v37 = vadd.f32 %v390_v63, %v373_v15  ;;  %v550_v48 = vadd.f32 %v545_v47, %v529_v6  ;;  %v980_v47 = vstv %s2801_s14 }
 0x177   : > { %v547_v54 = vpop.permute.xlu1 %546  ;;  %v409_v55 = vpop.permute.xlu0 %408 }
 0x178   : > { %v414_v59 = vadd.f32 %v409_v55, %v393_v49  ;;  %v551_v60 = vadd.f32 %v547_v54, %v530_v26  ;;  %v945_v26 = vstv %s2752_s8  ;;  %v1005_v49 = vstv %s2803_s15  ;;  %s2860_s8 = sld [smem:[#allocation7 + $0x18]] }
 0x17a   : > { %v2750_v1 = vadd.f32 %v2595_v13, %v414_v59  ;;  %v1030_v59 = vstv %s2805_s11 }
 0x17b   : > { %v411_v61 = vpop.permute.xlu1 %410  ;;  %v566_v51 = vpop.permute.xlu0 %565 }
 0x17c   : > { %v415_v58 = vadd.f32 %v411_v61, %v394_v37  ;;  %v571_v43 = vadd.f32 %v566_v51, %v550_v48  ;;  %v1055_v37 = vstv %s2807_s21  ;;  %v1080_v48 = vstv %s2809_s0  ;;  %s2101_s0 = smov 16  }
 0x17e   : > { %v2755_v19 = vadd.f32 %v2598_v42, %v415_v58  ;;  %v2758_v50 = vadd.f32 %v2613_v52, %v571_v43  ;;  %v1130_v58 = vstv %s2815_s2  ;;  %s2103_s2 = smov 48  }
 0x17f   : > { %v568_v11 = vpop.permute.xlu1 %567  ;;  %v701_v23 = vpop.permute.xlu0 %700 }
 0x180   : > { %v572_v13 = vadd.f32 %v568_v11, %v551_v60  ;;  %v706_v33 = vadd.f32 %v701_v23, %v685_v0  ;;  %v1095_v0 = vstv %s2773_s28  ;;  %s2106_s28 = smov 96  }
 0x182   : > { %v2769_v14 = vadd.f32 %v2620_v62, %v572_v13 }
 0x183   : > { %v703_v42 = vpop.permute.xlu1 %702  ;;  %v722_v52 = vpop.permute.xlu0 %721 }
 0x184   : > { %v727_v5 = vadd.f32 %v722_v52, %v706_v33  ;;  %v707_v16 = vadd.f32 %v703_v42, %v686_v30  ;;  %v949_v30 = vstv %s2777_s30  ;;  %s1916_s30 = sshll.u32 %s3197_s19, 4 }
 0x185   : > { %s3112_s6 = scalar_lea.vmem %s3164_s3, %s1916_s30 }
 0x186   : > { %v2782_v29 = vadd.f32 %v2633_v10, %v727_v5 }
 0x187   : > { %v724_v31 = vpop.permute.xlu1 %723  ;;  %v857_v62 = vpop.permute.xlu0 %856 }
 0x188   : > { %v728_v21 = vadd.f32 %v724_v31, %v707_v16 }
 0x18a   : > { %v2793_v15 = vadd.f32 %v2636_v7, %v728_v21  ;;  %v862_v7 = vadd.f32 %v857_v62, %v841_v35  ;;  %v1074_v35 = vstv %s2790_s10 }
 0x18b   : > { %v859_v6 = vpop.permute.xlu1 %858  ;;  %v448_v34 = vpop.permute.xlu0 %447 }
 0x18c   : > { %v863_v56 = vadd.f32 %v859_v6, %v2747_v17  ;;  %v453_v40 = vadd.f32 %v448_v34, %v2750_v1  ;;  %v1105_v1 = vstv %s2811_s1  ;;  %s2102_s1 = smov 32  }
 0x18f   : > { %v450_v10 = vpop.permute.xlu1 %449  ;;  %v604_v12 = vpop.permute.xlu0 %603 }
 0x190   : > { %v454_v17 = vadd.f32 %v450_v10, %v2755_v19  ;;  %v609_v63 = vadd.f32 %v604_v12, %v2758_v50 }
 0x193   : > { %v606_v32 = vpop.permute.xlu1 %605  ;;  %v878_v25 = vpop.permute.xlu0 %877 }
 0x194   : > { %v883_v24 = vadd.f32 %v878_v25, %v862_v7  ;;  %v610_v60 = vadd.f32 %v606_v32, %v2769_v14 }
 0x196   : > { %v2825_v39 = vadd.f32 %v2641_v28, %v883_v24  ;;  %v1099_v28 = vstv %s2795_s9 }
 0x197   : > { %v880_v44 = vpop.permute.xlu1 %879  ;;  %v469_v57 = vpop.permute.xlu0 %468 }
 0x198   : > { %v884_v41 = vadd.f32 %v880_v44, %v863_v56  ;;  %v474_v46 = vadd.f32 %v469_v57, %v453_v40 }
 0x19a   : > { %v2847_v43 = vadd.f32 %v2644_v45, %v884_v41  ;;  %v946_v19 = vmul.f32 %v945_v26, %v474_v46  ;;  %v971_v50 = vmul.f32 %v970_v18, %v474_v46  ;;  %v996_v11 = vmul.f32 %v995_v2, %v474_v46 }
 0x19b   : > { %v471_v54 = vpop.permute.xlu1 %470  ;;  %v625_v55 = vpop.permute.xlu0 %624  ;;  %v1021_v23 = vmul.f32 %v1020_v8, %v474_v46  ;;  %v1046_v13 = vmul.f32 %v1045_v36, %v474_v46  ;;  %v1071_v33 = vmul.f32 %v1070_v9, %v474_v46  ;;  %v1096_v45 = vmul.f32 %v1095_v0, %v474_v46 }
 0x19c   : > { %v475_v61 = vadd.f32 %v471_v54, %v454_v17  ;;  %v630_v51 = vadd.f32 %v625_v55, %v609_v63  ;;  %v1121_v14 = vmul.f32 %v1120_v38, %v474_v46 }
 0x19e   : > { %v947_v42 = vmul.f32 %v945_v26, %v475_v61  ;;  %v972_v52 = vmul.f32 %v970_v18, %v475_v61  ;;  %v997_v5 = vmul.f32 %v995_v2, %v475_v61  ;;  %v950_v62 = vmul.f32 %v949_v30, %v630_v51 }
 0x19f   : > { %v627_v16 = vpop.permute.xlu1 %626  ;;  %v760_v31 = vpop.permute.xlu0 %759  ;;  %v975_v21 = vmul.f32 %v974_v53, %v630_v51  ;;  %v1000_v6 = vmul.f32 %v999_v22, %v630_v51  ;;  %v1025_v34 = vmul.f32 %v1024_v3, %v630_v51  ;;  %v1050_v10 = vmul.f32 %v1049_v27, %v630_v51 }
 0x1a0   : > { %v1075_v12 = vmul.f32 %v1074_v35, %v630_v51  ;;  %v1100_v7 = vmul.f32 %v1099_v28, %v630_v51  ;;  %v1125_v32 = vmul.f32 %v1124_v20, %v630_v51  ;;  %v952_v25 = vadd.f32 %v950_v62, %v946_v19 }
 0x1a1   : > { %v977_v24 = vadd.f32 %v975_v21, %v971_v50  ;;  %v1002_v26 = vadd.f32 %v1000_v6, %v996_v11  ;;  %v1027_v18 = vadd.f32 %v1025_v34, %v1021_v23  ;;  %v1052_v2 = vadd.f32 %v1050_v10, %v1046_v13 }
 0x1a2   : > { %v1077_v56 = vadd.f32 %v1075_v12, %v1071_v33  ;;  %v1102_v40 = vadd.f32 %v1100_v7, %v1096_v45  ;;  %v1127_v44 = vadd.f32 %v1125_v32, %v1121_v14  ;;  %v1022_v46 = vmul.f32 %v1020_v8, %v475_v61 }
 0x1a3   : > { %v762_v57 = vpop.permute.xlu1 %761  ;;  %v781_v41 = vpop.permute.xlu0 %780  ;;  %v1047_v17 = vmul.f32 %v1045_v36, %v475_v61  ;;  %v1072_v63 = vmul.f32 %v1070_v9, %v475_v61  ;;  %v631_v54 = vadd.f32 %v627_v16, %v610_v60  ;;  %v1097_v55 = vmul.f32 %v1095_v0, %v475_v61 }
 0x1a4   : > { %v1122_v51 = vmul.f32 %v1120_v38, %v475_v61  ;;  %v765_v19 = vadd.f32 %v760_v31, %v2782_v29  ;;  %v766_v50 = vadd.f32 %v762_v57, %v2793_v15  ;;  %v986_v33 = vstv %s2870_s22 }
 0x1a5   : > { %v951_v11 = vmul.f32 %v949_v30, %v631_v54  ;;  %v976_v23 = vmul.f32 %v974_v53, %v631_v54  ;;  %v1001_v13 = vmul.f32 %v999_v22, %v631_v54  ;;  %v1026_v8 = vmul.f32 %v1024_v3, %v631_v54 }
 0x1a6   : > { %v1051_v36 = vmul.f32 %v1049_v27, %v631_v54  ;;  %v1076_v9 = vmul.f32 %v1074_v35, %v631_v54  ;;  %v1101_v0 = vmul.f32 %v1099_v28, %v631_v54  ;;  %v1126_v29 = vmul.f32 %v1124_v20, %v631_v54 }
 0x1a7   : > { %v953_v15 = vadd.f32 %v951_v11, %v947_v42  ;;  %v978_v38 = vadd.f32 %v976_v23, %v972_v52  ;;  %v1003_v30 = vadd.f32 %v1001_v13, %v997_v5  ;;  %v1028_v53 = vadd.f32 %v1026_v8, %v1022_v46  ;;  %v783_v22 = vpop.permute.xlu1 %782  ;;  %v916_v3 = vpop.permute.xlu0 %915 }
 0x1a8   : > { %v1053_v61 = vadd.f32 %v1051_v36, %v1047_v17  ;;  %v1078_v27 = vadd.f32 %v1076_v9, %v1072_v63  ;;  %v1103_v35 = vadd.f32 %v1101_v0, %v1097_v55  ;;  %v1128_v60 = vadd.f32 %v1126_v29, %v1122_v51 }
 0x1a9   : > { %v786_v28 = vadd.f32 %v781_v41, %v765_v19  ;;  %v961_v20 = vstv %s2860_s8  ;;  %v1011_v45 = vstv %s2880_s24  ;;  %v787_v14 = vadd.f32 %v783_v22, %v766_v50 }
 0x1aa   : > { %v921_v42 = vadd.f32 %v916_v3, %v2825_v39  ;;  %v1036_v52 = vstv %s2882_s23  ;;  %v1061_v5 = vstv %s2884_s17  ;;  %v1111_v11 = vstv %s2922_s25  ;;  %s2104_s17 = smov 64   ;;  %s2105_s23 = smov 80  }
 0x1ab   : > { %v956_v16 = vmul.f32 %v955_v4, %v786_v28  ;;  %v981_v31 = vmul.f32 %v980_v47, %v786_v28  ;;  %v1006_v62 = vmul.f32 %v1005_v49, %v786_v28  ;;  %v1031_v21 = vmul.f32 %v1030_v59, %v786_v28 }
 0x1ac   : > { %v1056_v39 = vmul.f32 %v1055_v37, %v786_v28  ;;  %v1081_v6 = vmul.f32 %v1080_v48, %v786_v28  ;;  %v1106_v34 = vmul.f32 %v1105_v1, %v786_v28  ;;  %v1131_v10 = vmul.f32 %v1130_v58, %v786_v28 }
 0x1ad   : > { %v958_v12 = vadd.f32 %v956_v16, %v952_v25  ;;  %v983_v7 = vadd.f32 %v981_v31, %v977_v24  ;;  %v1008_v32 = vadd.f32 %v1006_v62, %v1002_v26  ;;  %v1033_v57 = vadd.f32 %v1031_v21, %v1027_v18  ;;  %v918_v18 = vpop.permute.xlu1 %917 }
 0x1ae   : > { %v1058_v41 = vadd.f32 %v1056_v39, %v1052_v2  ;;  %v1083_v46 = vadd.f32 %v1081_v6, %v1077_v56  ;;  %v1108_v17 = vadd.f32 %v1106_v34, %v1102_v40  ;;  %v1133_v63 = vadd.f32 %v1131_v10, %v1127_v44 }
 0x1af   : > { %v957_v54 = vmul.f32 %v955_v4, %v787_v14  ;;  %v982_v55 = vmul.f32 %v980_v47, %v787_v14  ;;  %v1007_v51 = vmul.f32 %v1005_v49, %v787_v14  ;;  %v1032_v19 = vmul.f32 %v1030_v59, %v787_v14  ;;  %v937_v4 = vpop.permute.xlu0 %936 }
 0x1b0   : > { %v1057_v50 = vmul.f32 %v1055_v37, %v787_v14  ;;  %v1082_v25 = vmul.f32 %v1080_v48, %v787_v14  ;;  %v1107_v24 = vmul.f32 %v1105_v1, %v787_v14  ;;  %v1132_v26 = vmul.f32 %v1130_v58, %v787_v14 }
 0x1b1   : > { %v959_v47 = vadd.f32 %v957_v54, %v953_v15  ;;  %v984_v49 = vadd.f32 %v982_v55, %v978_v38  ;;  %v1009_v2 = vadd.f32 %v1007_v51, %v1003_v30  ;;  %v1034_v59 = vadd.f32 %v1032_v19, %v1028_v53  ;;  %v939_v30 = vpop.permute.xlu1 %938 }
 0x1b2   : > { %v1059_v56 = vadd.f32 %v1057_v50, %v1053_v61  ;;  %v1084_v37 = vadd.f32 %v1082_v25, %v1078_v27  ;;  %v1109_v40 = vadd.f32 %v1107_v24, %v1103_v35  ;;  %v1134_v44 = vadd.f32 %v1132_v26, %v1128_v60 }
 0x1b3   : > { %v1086_v48 = vstv %s2917_s26  ;;  %v1136_v1 = vstv %s2932_s27  ;;  %v942_v23 = vadd.f32 %v937_v4, %v921_v42  ;;  %v922_v58 = vadd.f32 %v918_v18, %v2847_v43 }
 0x1b5   : > { %v962_v13 = vmul.f32 %v961_v20, %v942_v23  ;;  %v987_v8 = vmul.f32 %v986_v33, %v942_v23  ;;  %v1012_v36 = vmul.f32 %v1011_v45, %v942_v23  ;;  %v1037_v9 = vmul.f32 %v1036_v52, %v942_v23 }
 0x1b6   : > { %v1062_v0 = vmul.f32 %v1061_v5, %v942_v23  ;;  %v1087_v29 = vmul.f32 %v1086_v48, %v942_v23  ;;  %v1112_v15 = vmul.f32 %v1111_v11, %v942_v23  ;;  %v1137_v38 = vmul.f32 %v1136_v1, %v942_v23 }
 0x1b7   : > { %v964_v53 = vadd.f32 %v962_v13, %v958_v12  ;;  %v989_v22 = vadd.f32 %v987_v8, %v983_v7  ;;  %v1014_v3 = vadd.f32 %v1012_v36, %v1008_v32  ;;  %v1039_v43 = vadd.f32 %v1037_v9, %v1033_v57 }
 0x1b8   : > { %v1064_v61 = vadd.f32 %v1062_v0, %v1058_v41  ;;  %v1089_v27 = vadd.f32 %v1087_v29, %v1083_v46  ;;  %v1114_v35 = vadd.f32 %v1112_v15, %v1108_v17  ;;  %v1139_v60 = vadd.f32 %v1137_v38, %v1133_v63 }
 0x1b9   : > { %967 = vst.msk [vmem:[#allocation3] sm:$0xff] %vm966_vm5, %v964_v53  ;;  %992 = vst.msk [vmem:[#allocation3 + $0x10] sm:$0xff] %vm966_vm5, %v989_v22  ;;  %v943_v28 = vadd.f32 %v939_v30, %v922_v58 }
 0x1ba   : > { %1017 = vst.msk [vmem:[#allocation3 + $0x20] sm:$0xff] %vm966_vm5, %v1014_v3  ;;  %1042 = vst.msk [vmem:[#allocation3 + $0x30] sm:$0xff] %vm966_vm5, %v1039_v43 }
 0x1bb   : > { %1067 = vst.msk [vmem:[#allocation3 + $0x40] sm:$0xff] %vm966_vm5, %v1064_v61  ;;  %1092 = vst.msk [vmem:[#allocation3 + $0x50] sm:$0xff] %vm966_vm5, %v1089_v27  ;;  %v963_v14 = vmul.f32 %v961_v20, %v943_v28  ;;  %v988_v42 = vmul.f32 %v986_v33, %v943_v28  ;;  %v1013_v16 = vmul.f32 %v1011_v45, %v943_v28 }
 0x1bc   : > { %1117 = vst.msk [vmem:[#allocation3 + $0x60] sm:$0xff] %vm966_vm5, %v1114_v35  ;;  %1142 = vst.msk [vmem:[#allocation3 + $0x70] sm:$0xff] %vm966_vm5, %v1139_v60  ;;  %v1038_v31 = vmul.f32 %v1036_v52, %v943_v28  ;;  %v1063_v62 = vmul.f32 %v1061_v5, %v943_v28  ;;  %v1088_v21 = vmul.f32 %v1086_v48, %v943_v28 }
 0x1bd   : > { %v1113_v39 = vmul.f32 %v1111_v11, %v943_v28  ;;  %v1138_v6 = vmul.f32 %v1136_v1, %v943_v28  ;;  %v965_v34 = vadd.f32 %v963_v14, %v959_v47  ;;  %v990_v10 = vadd.f32 %v988_v42, %v984_v49 }
 0x1be   : > { %v1015_v12 = vadd.f32 %v1013_v16, %v1009_v2  ;;  %v1040_v7 = vadd.f32 %v1038_v31, %v1034_v59  ;;  %v1065_v32 = vadd.f32 %v1063_v62, %v1059_v56  ;;  %v1090_v57 = vadd.f32 %v1088_v21, %v1084_v37 }
 0x1bf   : > { %v1115_v41 = vadd.f32 %v1113_v39, %v1109_v40  ;;  %v1140_v46 = vadd.f32 %v1138_v6, %v1134_v44  ;;  %968 = vst.msk [vmem:[#allocation3 + $0x8] sm:$0xff] %vm966_vm5, %v965_v34  ;;  %993 = vst.msk [vmem:[#allocation3 + $0x18] sm:$0xff] %vm966_vm5, %v990_v10 }
 0x1c0   : > { %1018 = vst.msk [vmem:[#allocation3 + $0x28] sm:$0xff] %vm966_vm5, %v1015_v12  ;;  %1043 = vst.msk [vmem:[#allocation3 + $0x38] sm:$0xff] %vm966_vm5, %v1040_v7  ;;  %v1184_v20 = vld [vmem:[#allocation3 + $0x11] sm:$0x1]  ;;  %v1183_v51 = vld [vmem:[#allocation3 + $0x1] sm:$0x1] }
 0x1c1   : > { %1068 = vst.msk [vmem:[#allocation3 + $0x48] sm:$0xff] %vm966_vm5, %v1065_v32  ;;  %1093 = vst.msk [vmem:[#allocation3 + $0x58] sm:$0xff] %vm966_vm5, %v1090_v57  ;;  %v1185_v33 = vld [vmem:[#allocation3 + $0x21] sm:$0x1]  ;;  %v1186_v45 = vld [vmem:[#allocation3 + $0x31] sm:$0x1] }
 0x1c2   : > { %1118 = vst.msk [vmem:[#allocation3 + $0x68] sm:$0xff] %vm966_vm5, %v1115_v41  ;;  %1143 = vst.msk [vmem:[#allocation3 + $0x78] sm:$0xff] %vm966_vm5, %v1140_v46  ;;  %v1187_v52 = vld [vmem:[#allocation3 + $0x41] sm:$0x1]  ;;  %v1188_v5 = vld [vmem:[#allocation3 + $0x51] sm:$0x1] }
 0x1c3   : > { %v1189_v17 = vld [vmem:[#allocation3 + $0x61] sm:$0x1]  ;;  %v1190_v63 = vld [vmem:[#allocation3 + $0x71] sm:$0x1]  ;;  %v1199_v54 = vrot.slane %v1184_v20, 7  ;;  %v1201_v55 = vrot.slane %v1185_v33, 6 }
 0x1c4   : > { %v1203_v50 = vrot.slane %v1186_v45, 5  ;;  %v1205_v25 = vrot.slane %v1187_v52, 4  ;;  %v1207_v26 = vrot.slane %v1188_v5, 3  ;;  %v1209_v18 = vrot.slane %v1189_v17, 2  ;;  %v1219_v59 = vld [vmem:[#allocation3 + $0x12] sm:$0x1] }
 0x1c5   : > { %v1200_v19 = vsel %vm1161_vm6, %v1199_v54, %v1183_v51  ;;  %v1211_v4 = vrot.slane %v1190_v63, 1  ;;  %v1220_v44 = vld [vmem:[#allocation3 + $0x22] sm:$0x1]  ;;  %v1221_v58 = vld [vmem:[#allocation3 + $0x32] sm:$0x1]  ;;  %v1234_v61 = vrot.slane %v1219_v59, 7 }
 0x1c6   : > { %v1202_v24 = vsel %vm1164_vm7, %v1201_v55, %v1200_v19  ;;  %v1461_v49 = vld [vmem:[#allocation3 + $0x19] sm:$0x1]  ;;  %v1460_v8 = vld [vmem:[#allocation3 + $0x9] sm:$0x1]  ;;  %v1218_v30 = vld [vmem:[#allocation3 + $0x2] sm:$0x1] }
 0x1c7   : > { %v1204_v47 = vsel %vm1167_vm8, %v1203_v50, %v1202_v24  ;;  %v1462_v2 = vld [vmem:[#allocation3 + $0x29] sm:$0x1]  ;;  %v1463_v37 = vld [vmem:[#allocation3 + $0x39] sm:$0x1]  ;;  %v1476_v1 = vrot.slane %v1461_v49, 7  ;;  %v1236_v27 = vrot.slane %v1220_v44, 6  ;;  %v1235_v21 = vsel %vm1161_vm6, %v1234_v61, %v1218_v30 }
 0x1c8   : > { %v1206_v56 = vsel %vm1170_vm9, %v1205_v25, %v1204_v47  ;;  %v1464_v40 = vld [vmem:[#allocation3 + $0x49] sm:$0x1]  ;;  %v1465_v11 = vld [vmem:[#allocation3 + $0x59] sm:$0x1]  ;;  %v1478_v23 = vrot.slane %v1462_v2, 6  ;;  %v1480_v15 = vrot.slane %v1463_v37, 5 }
 0x1c9   : > { %v1208_v48 = vsel %vm1173_vm10, %v1207_v26, %v1206_v56  ;;  %v1466_v36 = vld [vmem:[#allocation3 + $0x69] sm:$0x1]  ;;  %v1467_v9 = vld [vmem:[#allocation3 + $0x79] sm:$0x1]  ;;  %v1477_v29 = vsel %vm1161_vm6, %v1476_v1, %v1460_v8  ;;  %v1482_v38 = vrot.slane %v1464_v40, 4  ;;  %v1484_v43 = vrot.slane %v1465_v11, 3 }
 0x1ca   : > { %v1210_v13 = vsel %vm1176_vm11, %v1209_v18, %v1208_v48  ;;  %v1222_v53 = vld [vmem:[#allocation3 + $0x42] sm:$0x1]  ;;  %v1223_v22 = vld [vmem:[#allocation3 + $0x52] sm:$0x1]  ;;  %v1479_v3 = vsel %vm1164_vm7, %v1478_v23, %v1477_v29  ;;  %v1495_v35 = vld [vmem:[#allocation3 + $0x1a] sm:$0x1]  ;;  %v1237_v12 = vsel %vm1164_vm7, %v1236_v27, %v1235_v21 }
 0x1cb   : > { %v1212_v0 = vsel %vm1179_vm12, %v1211_v4, %v1210_v13  ;;  %v1481_v60 = vsel %vm1167_vm8, %v1480_v15, %v1479_v3  ;;  %v1486_v28 = vrot.slane %v1466_v36, 2  ;;  %v1488_v14 = vrot.slane %v1467_v9, 1  ;;  %v1224_v42 = vld [vmem:[#allocation3 + $0x62] sm:$0x1]  ;;  %v1496_v16 = vld [vmem:[#allocation3 + $0x2a] sm:$0x1] }
 0x1cc   : > { %1213 = vrot.lane.b32.xlu0 %v1212_v0, %s2101_s0  ;;  %v1483_v31 = vsel %vm1170_vm9, %v1482_v38, %v1481_v60  ;;  %v1225_v62 = vld [vmem:[#allocation3 + $0x72] sm:$0x1]  ;;  %v1238_v39 = vrot.slane %v1221_v58, 5  ;;  %v1497_v6 = vld [vmem:[#allocation3 + $0x3a] sm:$0x1]  ;;  %v1510_v34 = vrot.slane %v1495_v35, 7 }
 0x1cd   : > { %v1485_v10 = vsel %vm1173_vm10, %v1484_v43, %v1483_v31  ;;  %v1240_v7 = vrot.slane %v1222_v53, 4  ;;  %v1242_v32 = vrot.slane %v1223_v22, 3  ;;  %v1494_v57 = vld [vmem:[#allocation3 + $0xa] sm:$0x1]  ;;  %v1499_v33 = vld [vmem:[#allocation3 + $0x5a] sm:$0x1] }
 0x1ce   : > { %v1498_v41 = vld [vmem:[#allocation3 + $0x4a] sm:$0x1]  ;;  %v1487_v46 = vsel %vm1176_vm11, %v1486_v28, %v1485_v10  ;;  %v1239_v20 = vsel %vm1167_vm8, %v1238_v39, %v1237_v12  ;;  %v1511_v45 = vsel %vm1161_vm6, %v1510_v34, %v1494_v57  ;;  %v1512_v52 = vrot.slane %v1496_v16, 6  ;;  %v1254_v5 = vld [vmem:[#allocation3 + $0x13] sm:$0x1] }
 0x1cf   : > { %v1489_v17 = vsel %vm1179_vm12, %v1488_v14, %v1487_v46  ;;  %v1241_v63 = vsel %vm1170_vm9, %v1240_v7, %v1239_v20  ;;  %v1244_v54 = vrot.slane %v1224_v42, 2  ;;  %v1500_v55 = vld [vmem:[#allocation3 + $0x6a] sm:$0x1]  ;;  %v1514_v51 = vrot.slane %v1497_v6, 5  ;;  %v1255_v19 = vld [vmem:[#allocation3 + $0x23] sm:$0x1] }
 0x1d0   : > { %1490 = vrot.lane.b32.xlu1 %v1489_v17, %s2101_s0  ;;  %v1243_v50 = vsel %vm1173_vm10, %v1242_v32, %v1241_v63  ;;  %v1246_v25 = vrot.slane %v1225_v62, 1  ;;  %v1501_v24 = vld [vmem:[#allocation3 + $0x7a] sm:$0x1]  ;;  %v1513_v26 = vsel %vm1164_vm7, %v1512_v52, %v1511_v45  ;;  %v1516_v18 = vrot.slane %v1498_v41, 4  ;;  %v1256_v4 = vld [vmem:[#allocation3 + $0x33] sm:$0x1] }
 0x1d1   : > { %v1245_v47 = vsel %vm1176_vm11, %v1244_v54, %v1243_v50  ;;  %v1515_v49 = vsel %vm1167_vm8, %v1514_v51, %v1513_v26  ;;  %v1518_v2 = vrot.slane %v1499_v33, 3  ;;  %v1257_v59 = vld [vmem:[#allocation3 + $0x43] sm:$0x1]  ;;  %v1258_v56 = vld [vmem:[#allocation3 + $0x53] sm:$0x1]  ;;  %v1269_v37 = vrot.slane %v1254_v5, 7 }
 0x1d2   : > { %v1247_v40 = vsel %vm1179_vm12, %v1246_v25, %v1245_v47  ;;  %v1517_v44 = vsel %vm1170_vm9, %v1516_v18, %v1515_v49  ;;  %v1520_v48 = vrot.slane %v1500_v55, 2  ;;  %v1253_v11 = vld [vmem:[#allocation3 + $0x3] sm:$0x1]  ;;  %v1271_v1 = vrot.slane %v1255_v19, 6  ;;  %v1529_v23 = vld [vmem:[#allocation3 + $0x1b] sm:$0x1] }
 0x1d3   : > { %1248 = vrot.lane.b32.xlu0 %v1247_v40, %s2102_s1  ;;  %v1519_v58 = vsel %vm1173_vm10, %v1518_v2, %v1517_v44  ;;  %v1522_v13 = vrot.slane %v1501_v24, 1  ;;  %v1259_v8 = vld [vmem:[#allocation3 + $0x63] sm:$0x1]  ;;  %v1270_v36 = vsel %vm1161_vm6, %v1269_v37, %v1253_v11  ;;  %v1273_v9 = vrot.slane %v1256_v4, 5  ;;  %v1530_v0 = vld [vmem:[#allocation3 + $0x2b] sm:$0x1] }
 0x1d4   : > { %v1521_v29 = vsel %vm1176_vm11, %v1520_v48, %v1519_v58  ;;  %v1260_v15 = vld [vmem:[#allocation3 + $0x73] sm:$0x1]  ;;  %v1272_v38 = vsel %vm1164_vm7, %v1271_v1, %v1270_v36  ;;  %v1275_v30 = vrot.slane %v1257_v59, 4  ;;  %v1277_v53 = vrot.slane %v1258_v56, 3  ;;  %v1531_v22 = vld [vmem:[#allocation3 + $0x3b] sm:$0x1] }
 0x1d5   : > { %v1523_v3 = vsel %vm1179_vm12, %v1522_v13, %v1521_v29  ;;  %v1274_v43 = vsel %vm1167_vm8, %v1273_v9, %v1272_v38  ;;  %v1532_v61 = vld [vmem:[#allocation3 + $0x4b] sm:$0x1]  ;;  %v1533_v27 = vld [vmem:[#allocation3 + $0x5b] sm:$0x1]  ;;  %v1544_v35 = vrot.slane %v1529_v23, 7  ;;  %v1546_v60 = vrot.slane %v1530_v0, 6 }
 0x1d6   : > { %1524 = vrot.lane.b32.xlu1 %v1523_v3, %s2102_s1  ;;  %v1276_v28 = vsel %vm1170_vm9, %v1275_v30, %v1274_v43  ;;  %v1279_v14 = vrot.slane %v1259_v8, 2  ;;  %v1528_v42 = vld [vmem:[#allocation3 + $0xb] sm:$0x1]  ;;  %v1281_v62 = vrot.slane %v1260_v15, 1  ;;  %v1548_v39 = vrot.slane %v1531_v22, 5 }
 0x1d7   : > { %v1534_v16 = vld [vmem:[#allocation3 + $0x6b] sm:$0x1]  ;;  %v1278_v31 = vsel %vm1173_vm10, %v1277_v53, %v1276_v28  ;;  %v1545_v21 = vsel %vm1161_vm6, %v1544_v35, %v1528_v42  ;;  %v1289_v6 = vld [vmem:[#allocation3 + $0x14] sm:$0x1]  ;;  %v1290_v34 = vld [vmem:[#allocation3 + $0x24] sm:$0x1] }
 0x1d8   : > { %v1280_v10 = vsel %vm1176_vm11, %v1279_v14, %v1278_v31  ;;  %v1535_v12 = vld [vmem:[#allocation3 + $0x7b] sm:$0x1]  ;;  %v1547_v7 = vsel %vm1164_vm7, %v1546_v60, %v1545_v21  ;;  %v1550_v32 = vrot.slane %v1532_v61, 4  ;;  %v1552_v57 = vrot.slane %v1533_v27, 3  ;;  %v1291_v41 = vld [vmem:[#allocation3 + $0x34] sm:$0x1] }
 0x1d9   : > { %v1282_v46 = vsel %vm1179_vm12, %v1281_v62, %v1280_v10  ;;  %v1549_v20 = vsel %vm1167_vm8, %v1548_v39, %v1547_v7  ;;  %v1292_v33 = vld [vmem:[#allocation3 + $0x44] sm:$0x1]  ;;  %v1293_v45 = vld [vmem:[#allocation3 + $0x54] sm:$0x1]  ;;  %v1304_v52 = vrot.slane %v1289_v6, 7  ;;  %v1306_v5 = vrot.slane %v1290_v34, 6 }
 0x1da   : > { %1283 = vrot.lane.b32.xlu0 %v1282_v46, %s2103_s2  ;;  %v1551_v17 = vsel %vm1170_vm9, %v1550_v32, %v1549_v20  ;;  %v1554_v63 = vrot.slane %v1534_v16, 2  ;;  %v1288_v54 = vld [vmem:[#allocation3 + $0x4] sm:$0x1]  ;;  %v1556_v19 = vrot.slane %v1535_v12, 1  ;;  %v1308_v25 = vrot.slane %v1291_v41, 5 }
 0x1db   : > { %v1294_v55 = vld [vmem:[#allocation3 + $0x64] sm:$0x1]  ;;  %v1553_v51 = vsel %vm1173_vm10, %v1552_v57, %v1551_v17  ;;  %v1305_v50 = vsel %vm1161_vm6, %v1304_v52, %v1288_v54  ;;  %v1563_v24 = vld [vmem:[#allocation3 + $0x1c] sm:$0x1]  ;;  %v1564_v26 = vld [vmem:[#allocation3 + $0x2c] sm:$0x1] }
 0x1dc   : > { %v1555_v18 = vsel %vm1176_vm11, %v1554_v63, %v1553_v51  ;;  %v1295_v4 = vld [vmem:[#allocation3 + $0x74] sm:$0x1]  ;;  %v1307_v47 = vsel %vm1164_vm7, %v1306_v5, %v1305_v50  ;;  %v1310_v49 = vrot.slane %v1292_v33, 4  ;;  %v1312_v2 = vrot.slane %v1293_v45, 3  ;;  %v1565_v59 = vld [vmem:[#allocation3 + $0x3c] sm:$0x1] }
 0x1dd   : > { %v1557_v56 = vsel %vm1179_vm12, %v1556_v19, %v1555_v18  ;;  %v1309_v37 = vsel %vm1167_vm8, %v1308_v25, %v1307_v47  ;;  %v1566_v40 = vld [vmem:[#allocation3 + $0x4c] sm:$0x1]  ;;  %v1567_v44 = vld [vmem:[#allocation3 + $0x5c] sm:$0x1]  ;;  %v1578_v48 = vrot.slane %v1563_v24, 7  ;;  %v1580_v11 = vrot.slane %v1564_v26, 6 }
 0x1de   : > { %1558 = vrot.lane.b32.xlu1 %v1557_v56, %s2103_s2  ;;  %v1311_v1 = vsel %vm1170_vm9, %v1310_v49, %v1309_v37  ;;  %v1314_v23 = vrot.slane %v1294_v55, 2  ;;  %v1562_v58 = vld [vmem:[#allocation3 + $0xc] sm:$0x1]  ;;  %v1316_v36 = vrot.slane %v1295_v4, 1  ;;  %v1582_v0 = vrot.slane %v1565_v59, 5 }
 0x1df   : > { %v1568_v13 = vld [vmem:[#allocation3 + $0x6c] sm:$0x1]  ;;  %v1313_v8 = vsel %vm1173_vm10, %v1312_v2, %v1311_v1  ;;  %v1579_v9 = vsel %vm1161_vm6, %v1578_v48, %v1562_v58  ;;  %v1324_v29 = vld [vmem:[#allocation3 + $0x15] sm:$0x1]  ;;  %v1325_v15 = vld [vmem:[#allocation3 + $0x25] sm:$0x1] }
 0x1e0   : > { %v1315_v38 = vsel %vm1176_vm11, %v1314_v23, %v1313_v8  ;;  %v1569_v30 = vld [vmem:[#allocation3 + $0x7c] sm:$0x1]  ;;  %v1581_v53 = vsel %vm1164_vm7, %v1580_v11, %v1579_v9  ;;  %v1584_v22 = vrot.slane %v1566_v40, 4  ;;  %v1586_v3 = vrot.slane %v1567_v44, 3  ;;  %v1326_v43 = vld [vmem:[#allocation3 + $0x35] sm:$0x1] }
 0x1e1   : > { %v1317_v61 = vsel %vm1179_vm12, %v1316_v36, %v1315_v38  ;;  %v1583_v27 = vsel %vm1167_vm8, %v1582_v0, %v1581_v53  ;;  %v1327_v35 = vld [vmem:[#allocation3 + $0x45] sm:$0x1]  ;;  %v1328_v60 = vld [vmem:[#allocation3 + $0x55] sm:$0x1]  ;;  %v1339_v28 = vrot.slane %v1324_v29, 7  ;;  %v1341_v14 = vrot.slane %v1325_v15, 6 }
 0x1e2   : > { %1318 = vrot.lane.b32.xlu0 %v1317_v61, %s2104_s17  ;;  %v1585_v42 = vsel %vm1170_vm9, %v1584_v22, %v1583_v27  ;;  %v1588_v16 = vrot.slane %v1568_v13, 2  ;;  %v1323_v31 = vld [vmem:[#allocation3 + $0x5] sm:$0x1]  ;;  %v1590_v39 = vrot.slane %v1569_v30, 1  ;;  %v1343_v34 = vrot.slane %v1326_v43, 5 }
 0x1e3   : > { %v1329_v62 = vld [vmem:[#allocation3 + $0x65] sm:$0x1]  ;;  %v1587_v21 = vsel %vm1173_vm10, %v1586_v3, %v1585_v42  ;;  %v1340_v6 = vsel %vm1161_vm6, %v1339_v28, %v1323_v31  ;;  %v1597_v10 = vld [vmem:[#allocation3 + $0x1d] sm:$0x1]  ;;  %v1598_v12 = vld [vmem:[#allocation3 + $0x2d] sm:$0x1] }
 0x1e4   : > { %v1589_v7 = vsel %vm1176_vm11, %v1588_v16, %v1587_v21  ;;  %v1330_v32 = vld [vmem:[#allocation3 + $0x75] sm:$0x1]  ;;  %v1342_v57 = vsel %vm1164_vm7, %v1341_v14, %v1340_v6  ;;  %v1345_v41 = vrot.slane %v1327_v35, 4  ;;  %v1347_v46 = vrot.slane %v1328_v60, 3  ;;  %v1599_v20 = vld [vmem:[#allocation3 + $0x3d] sm:$0x1] }
 0x1e5   : > { %v1591_v33 = vsel %vm1179_vm12, %v1590_v39, %v1589_v7  ;;  %v1344_v45 = vsel %vm1167_vm8, %v1343_v34, %v1342_v57  ;;  %v1600_v52 = vld [vmem:[#allocation3 + $0x4d] sm:$0x1]  ;;  %v1601_v5 = vld [vmem:[#allocation3 + $0x5d] sm:$0x1]  ;;  %v1612_v17 = vrot.slane %v1597_v10, 7  ;;  %v1614_v63 = vrot.slane %v1598_v12, 6 }
 0x1e6   : > { %1592 = vrot.lane.b32.xlu1 %v1591_v33, %s2104_s17  ;;  %v1346_v54 = vsel %vm1170_vm9, %v1345_v41, %v1344_v45  ;;  %v1349_v55 = vrot.slane %v1329_v62, 2  ;;  %v1596_v51 = vld [vmem:[#allocation3 + $0xd] sm:$0x1]  ;;  %v1351_v25 = vrot.slane %v1330_v32, 1  ;;  %v1616_v26 = vrot.slane %v1599_v20, 5 }
 0x1e7   : > { %v1602_v19 = vld [vmem:[#allocation3 + $0x6d] sm:$0x1]  ;;  %v1348_v50 = vsel %vm1173_vm10, %v1347_v46, %v1346_v54  ;;  %v1613_v24 = vsel %vm1161_vm6, %v1612_v17, %v1596_v51  ;;  %v1359_v18 = vld [vmem:[#allocation3 + $0x16] sm:$0x1]  ;;  %v1360_v4 = vld [vmem:[#allocation3 + $0x26] sm:$0x1] }
 0x1e8   : > { %v1350_v47 = vsel %vm1176_vm11, %v1349_v55, %v1348_v50  ;;  %v1603_v49 = vld [vmem:[#allocation3 + $0x7d] sm:$0x1]  ;;  %v1615_v2 = vsel %vm1164_vm7, %v1614_v63, %v1613_v24  ;;  %v1618_v59 = vrot.slane %v1600_v52, 4  ;;  %v1620_v56 = vrot.slane %v1601_v5, 3  ;;  %v1361_v37 = vld [vmem:[#allocation3 + $0x36] sm:$0x1] }
 0x1e9   : > { %v1352_v40 = vsel %vm1179_vm12, %v1351_v25, %v1350_v47  ;;  %v1617_v44 = vsel %vm1167_vm8, %v1616_v26, %v1615_v2  ;;  %v1362_v48 = vld [vmem:[#allocation3 + $0x46] sm:$0x1]  ;;  %v1363_v11 = vld [vmem:[#allocation3 + $0x56] sm:$0x1]  ;;  %v1374_v1 = vrot.slane %v1359_v18, 7  ;;  %v1376_v23 = vrot.slane %v1360_v4, 6 }
 0x1ea   : > { %1353 = vrot.lane.b32.xlu0 %v1352_v40, %s2105_s23  ;;  %v1619_v58 = vsel %vm1170_vm9, %v1618_v59, %v1617_v44  ;;  %v1622_v13 = vrot.slane %v1602_v19, 2  ;;  %v1358_v8 = vld [vmem:[#allocation3 + $0x6] sm:$0x1]  ;;  %v1624_v0 = vrot.slane %v1603_v49, 1  ;;  %v1378_v15 = vrot.slane %v1361_v37, 5 }
 0x1eb   : > { %v1364_v36 = vld [vmem:[#allocation3 + $0x66] sm:$0x1]  ;;  %v1621_v9 = vsel %vm1173_vm10, %v1620_v56, %v1619_v58  ;;  %v1375_v29 = vsel %vm1161_vm6, %v1374_v1, %v1358_v8  ;;  %v1631_v38 = vld [vmem:[#allocation3 + $0x1e] sm:$0x1]  ;;  %v1632_v30 = vld [vmem:[#allocation3 + $0x2e] sm:$0x1] }
 0x1ec   : > { %v1623_v53 = vsel %vm1176_vm11, %v1622_v13, %v1621_v9  ;;  %v1365_v22 = vld [vmem:[#allocation3 + $0x76] sm:$0x1]  ;;  %v1377_v3 = vsel %vm1164_vm7, %v1376_v23, %v1375_v29  ;;  %v1380_v43 = vrot.slane %v1362_v48, 4  ;;  %v1382_v61 = vrot.slane %v1363_v11, 3  ;;  %v1633_v27 = vld [vmem:[#allocation3 + $0x3e] sm:$0x1] }
 0x1ed   : > { %v1625_v35 = vsel %vm1179_vm12, %v1624_v0, %v1623_v53  ;;  %v1379_v60 = vsel %vm1167_vm8, %v1378_v15, %v1377_v3  ;;  %v1634_v28 = vld [vmem:[#allocation3 + $0x4e] sm:$0x1]  ;;  %v1635_v14 = vld [vmem:[#allocation3 + $0x5e] sm:$0x1]  ;;  %v1646_v42 = vrot.slane %v1631_v38, 7  ;;  %v1648_v16 = vrot.slane %v1632_v30, 6 }
 0x1ee   : > { %1626 = vrot.lane.b32.xlu1 %v1625_v35, %s2105_s23  ;;  %v1381_v31 = vsel %vm1170_vm9, %v1380_v43, %v1379_v60  ;;  %v1384_v62 = vrot.slane %v1364_v36, 2  ;;  %v1630_v21 = vld [vmem:[#allocation3 + $0xe] sm:$0x1]  ;;  %v1386_v34 = vrot.slane %v1365_v22, 1  ;;  %v1650_v12 = vrot.slane %v1633_v27, 5 }
 0x1ef   : > { %v1636_v39 = vld [vmem:[#allocation3 + $0x6e] sm:$0x1]  ;;  %v1383_v6 = vsel %vm1173_vm10, %v1382_v61, %v1381_v31  ;;  %v1647_v10 = vsel %vm1161_vm6, %v1646_v42, %v1630_v21  ;;  %v1394_v7 = vld [vmem:[#allocation3 + $0x17] sm:$0x1]  ;;  %v1395_v32 = vld [vmem:[#allocation3 + $0x27] sm:$0x1] }
 0x1f0   : > { %v1385_v57 = vsel %vm1176_vm11, %v1384_v62, %v1383_v6  ;;  %v1637_v41 = vld [vmem:[#allocation3 + $0x7e] sm:$0x1]  ;;  %v1649_v46 = vsel %vm1164_vm7, %v1648_v16, %v1647_v10  ;;  %v1652_v20 = vrot.slane %v1634_v28, 4  ;;  %v1654_v33 = vrot.slane %v1635_v14, 3  ;;  %v1396_v45 = vld [vmem:[#allocation3 + $0x37] sm:$0x1] }
 0x1f1   : > { %v1387_v52 = vsel %vm1179_vm12, %v1386_v34, %v1385_v57  ;;  %v1651_v5 = vsel %vm1167_vm8, %v1650_v12, %v1649_v46  ;;  %v1397_v17 = vld [vmem:[#allocation3 + $0x47] sm:$0x1]  ;;  %v1398_v63 = vld [vmem:[#allocation3 + $0x57] sm:$0x1]  ;;  %v1409_v54 = vrot.slane %v1394_v7, 7  ;;  %v1411_v55 = vrot.slane %v1395_v32, 6 }
 0x1f2   : > { %1388 = vrot.lane.b32.xlu0 %v1387_v52, %s2106_s28  ;;  %v1653_v51 = vsel %vm1170_vm9, %v1652_v20, %v1651_v5  ;;  %v1656_v19 = vrot.slane %v1636_v39, 2  ;;  %v1393_v50 = vld [vmem:[#allocation3 + $0x7] sm:$0x1]  ;;  %v1658_v26 = vrot.slane %v1637_v41, 1  ;;  %v1413_v4 = vrot.slane %v1396_v45, 5 }
 0x1f3   : > { %v1399_v25 = vld [vmem:[#allocation3 + $0x67] sm:$0x1]  ;;  %v1655_v24 = vsel %vm1173_vm10, %v1654_v33, %v1653_v51  ;;  %v1410_v18 = vsel %vm1161_vm6, %v1409_v54, %v1393_v50  ;;  %v1665_v47 = vld [vmem:[#allocation3 + $0x1f] sm:$0x1]  ;;  %v1666_v49 = vld [vmem:[#allocation3 + $0x2f] sm:$0x1] }
 0x1f4   : > { %v1657_v2 = vsel %vm1176_vm11, %v1656_v19, %v1655_v24  ;;  %v1400_v59 = vld [vmem:[#allocation3 + $0x77] sm:$0x1]  ;;  %v1412_v56 = vsel %vm1164_vm7, %v1411_v55, %v1410_v18  ;;  %v1415_v37 = vrot.slane %v1397_v17, 4  ;;  %v1417_v40 = vrot.slane %v1398_v63, 3  ;;  %v1667_v44 = vld [vmem:[#allocation3 + $0x3f] sm:$0x1] }
 0x1f5   : > { %v1659_v48 = vsel %vm1179_vm12, %v1658_v26, %v1657_v2  ;;  %v1414_v11 = vsel %vm1167_vm8, %v1413_v4, %v1412_v56  ;;  %v1668_v1 = vld [vmem:[#allocation3 + $0x4f] sm:$0x1]  ;;  %v1669_v23 = vld [vmem:[#allocation3 + $0x5f] sm:$0x1]  ;;  %v1680_v58 = vrot.slane %v1665_v47, 7  ;;  %v1682_v13 = vrot.slane %v1666_v49, 6 }
 0x1f6   : > { %1660 = vrot.lane.b32.xlu1 %v1659_v48, %s2106_s28  ;;  %v1416_v8 = vsel %vm1170_vm9, %v1415_v37, %v1414_v11  ;;  %v1419_v36 = vrot.slane %v1399_v25, 2  ;;  %v1664_v9 = vld [vmem:[#allocation3 + $0xf] sm:$0x1]  ;;  %v1145_v0 = vld [vmem:[#allocation3 + $0x10] sm:$0x1]  ;;  %v1421_v15 = vrot.slane %v1400_v59, 1 }
 0x1f7   : > { %v1418_v29 = vsel %vm1173_vm10, %v1417_v40, %v1416_v8  ;;  %v1670_v38 = vld [vmem:[#allocation3 + $0x6f] sm:$0x1]  ;;  %v1681_v30 = vsel %vm1161_vm6, %v1680_v58, %v1664_v9  ;;  %v1684_v53 = vrot.slane %v1667_v44, 5  ;;  %v1146_v22 = vld [vmem:[#allocation3 + $0x20] sm:$0x1]  ;;  %v1686_v27 = vrot.slane %v1668_v1, 4 }
 0x1f8   : > { %v1420_v3 = vsel %vm1176_vm11, %v1419_v36, %v1418_v29  ;;  %v1671_v43 = vld [vmem:[#allocation3 + $0x7f] sm:$0x1]  ;;  %v1683_v61 = vsel %vm1164_vm7, %v1682_v13, %v1681_v30  ;;  %v1688_v35 = vrot.slane %v1669_v23, 3  ;;  %v1147_v60 = vld [vmem:[#allocation3 + $0x30] sm:$0x1]  ;;  %v1160_v31 = vrot.slane %v1145_v0, 7 }
 0x1f9   : > { %v1422_v28 = vsel %vm1179_vm12, %v1421_v15, %v1420_v3  ;;  %v1685_v14 = vsel %vm1167_vm8, %v1684_v53, %v1683_v61  ;;  %v1148_v42 = vld [vmem:[#allocation3 + $0x40] sm:$0x1]  ;;  %v1149_v16 = vld [vmem:[#allocation3 + $0x50] sm:$0x1]  ;;  %v1163_v62 = vrot.slane %v1146_v22, 6  ;;  %v1690_v39 = vrot.slane %v1670_v38, 2 }
 0x1fa   : > { %1423 = vrot.lane.b32.xlu0 %v1422_v28, %s2107_s29  ;;  %v1687_v21 = vsel %vm1170_vm9, %v1686_v27, %v1685_v14  ;;  %v1144_v6 = vld [vmem:[#allocation3] sm:$0x1]  ;;  %v1429_v34 = vld [vmem:[#allocation3 + $0x18] sm:$0x1]  ;;  %v1692_v12 = vrot.slane %v1671_v43, 1  ;;  %v1166_v32 = vrot.slane %v1147_v60, 5 }
 0x1fb   : > { %v1689_v10 = vsel %vm1173_vm10, %v1688_v35, %v1687_v21  ;;  %v1150_v7 = vld [vmem:[#allocation3 + $0x60] sm:$0x1]  ;;  %v1162_v57 = vsel %vm1161_vm6, %v1160_v31, %v1144_v6  ;;  %v1430_v41 = vld [vmem:[#allocation3 + $0x28] sm:$0x1]  ;;  %v1151_v20 = vld [vmem:[#allocation3 + $0x70] sm:$0x1] }
 0x1fc   : > { %v1691_v46 = vsel %vm1176_vm11, %v1690_v39, %v1689_v10  ;;  %v1169_v33 = vrot.slane %v1148_v42, 4  ;;  %v1172_v45 = vrot.slane %v1149_v16, 3  ;;  %v1165_v52 = vsel %vm1164_vm7, %v1163_v62, %v1162_v57  ;;  %v1431_v5 = vld [vmem:[#allocation3 + $0x38] sm:$0x1]  ;;  %v1432_v54 = vld [vmem:[#allocation3 + $0x48] sm:$0x1] }
 0x1fd   : > { %v1693_v17 = vsel %vm1179_vm12, %v1692_v12, %v1691_v46  ;;  %v1168_v63 = vsel %vm1167_vm8, %v1166_v32, %v1165_v52  ;;  %v1444_v55 = vrot.slane %v1429_v34, 7  ;;  %v1446_v51 = vrot.slane %v1430_v41, 6  ;;  %v1433_v25 = vld [vmem:[#allocation3 + $0x58] sm:$0x1]  ;;  %v1428_v24 = vld [vmem:[#allocation3 + $0x8] sm:$0x1] }
 0x1fe   : > { %1694 = vrot.lane.b32.xlu1 %v1693_v17, %s2107_s29  ;;  %v1175_v19 = vrot.slane %v1150_v7, 2  ;;  %v1171_v50 = vsel %vm1170_vm9, %v1169_v33, %v1168_v63  ;;  %v1178_v26 = vrot.slane %v1151_v20, 1  ;;  %v1434_v4 = vld [vmem:[#allocation3 + $0x68] sm:$0x1]  ;;  %v1448_v47 = vrot.slane %v1431_v5, 5 }
 0x1ff   : > { %v1174_v18 = vsel %vm1173_vm10, %v1172_v45, %v1171_v50  ;;  %v1445_v49 = vsel %vm1161_vm6, %v1444_v55, %v1428_v24  ;;  %v1435_v59 = vld [vmem:[#allocation3 + $0x78] sm:$0x1]  ;;  %v1450_v56 = vrot.slane %v1432_v54, 4  ;;  %v1452_v44 = vrot.slane %v1433_v25, 3 }
 0x200   : > { %v1177_v2 = vsel %vm1176_vm11, %v1175_v19, %v1174_v18  ;;  %v1447_v37 = vsel %vm1164_vm7, %v1446_v51, %v1445_v49  ;;  %v1454_v11 = vrot.slane %v1434_v4, 2  ;;  %v1456_v23 = vrot.slane %v1435_v59, 1 }
 0x201   : > { %v1180_v40 = vsel %vm1179_vm12, %v1178_v26, %v1177_v2  ;;  %v1449_v48 = vsel %vm1167_vm8, %v1448_v47, %v1447_v37 }
 0x202   : > { %1182 = vst.msk [vmem:[%s3112_s6] sm:$0xff] %vm966_vm5, %v1180_v40  ;;  %v1451_v1 = vsel %vm1170_vm9, %v1450_v56, %v1449_v48 }
 0x203   : > { %v1453_v58 = vsel %vm1173_vm10, %v1452_v44, %v1451_v1 }
 0x204   : > { %v1455_v13 = vsel %vm1176_vm11, %v1454_v11, %v1453_v58 }
 0x205   : > { %v1457_v8 = vsel %vm1179_vm12, %v1456_v23, %v1455_v13 }
 0x206   : > { %1459 = vst.msk [vmem:[%s3112_s6 + $0x8] sm:$0xff] %vm966_vm5, %v1457_v8  ;;  %vm1710_vm5 = vcmask 15368  }
 0x23e   : > { %v1214_v36 = vpop.permute.xlu0 %1213 }
 0x23f   : > { %1217 = vst.msk [vmem:[%s3112_s6] sm:$0xff] %vm1216_vm13, %v1214_v36 }
 0x242   : > { %v1491_v9 = vpop.permute.xlu1 %1490 }
 0x243   : > { %1493 = vst.msk [vmem:[%s3112_s6 + $0x8] sm:$0xff] %vm1216_vm13, %v1491_v9 }
 0x245   : > { %v1249_v0 = vpop.permute.xlu0 %1248 }
 0x246   : > { %1252 = vst.msk [vmem:[%s3112_s6] sm:$0xff] %vm1251_vm14, %v1249_v0 }
 0x248   : > { %v1525_v29 = vpop.permute.xlu1 %1524 }
 0x249   : > { %1527 = vst.msk [vmem:[%s3112_s6 + $0x8] sm:$0xff] %vm1251_vm14, %v1525_v29 }
 0x24c   : > { %v1284_v15 = vpop.permute.xlu0 %1283 }
 0x24d   : > { %1287 = vst.msk [vmem:[%s3112_s6] sm:$0xff] %vm1286_vm15, %v1284_v15 }
 0x250   : > { %v1559_v38 = vpop.permute.xlu1 %1558 }
 0x251   : > { %1561 = vst.msk [vmem:[%s3112_s6 + $0x8] sm:$0xff] %vm1286_vm15, %v1559_v38 }
 0x254   : > { %v1319_v30 = vpop.permute.xlu0 %1318 }
 0x255   : > { %1322 = vst.msk [vmem:[%s3112_s6] sm:$0xff] %vm1321_vm0, %v1319_v30 }
 0x258   : > { %v1593_v53 = vpop.permute.xlu1 %1592 }
 0x259   : > { %1595 = vst.msk [vmem:[%s3112_s6 + $0x8] sm:$0xff] %vm1321_vm0, %v1593_v53 }
 0x25c   : > { %v1354_v22 = vpop.permute.xlu0 %1353 }
 0x25d   : > { %1357 = vst.msk [vmem:[%s3112_s6] sm:$0xff] %vm1356_vm1, %v1354_v22 }
 0x260   : > { %v1627_v3 = vpop.permute.xlu1 %1626 }
 0x261   : > { %1629 = vst.msk [vmem:[%s3112_s6 + $0x8] sm:$0xff] %vm1356_vm1, %v1627_v3 }
 0x264   : > { %v1389_v43 = vpop.permute.xlu0 %1388 }
 0x265   : > { %1392 = vst.msk [vmem:[%s3112_s6] sm:$0xff] %vm1391_vm2, %v1389_v43 }
 0x268   : > { %v1661_v61 = vpop.permute.xlu1 %1660 }
 0x269   : > { %1663 = vst.msk [vmem:[%s3112_s6 + $0x8] sm:$0xff] %vm1391_vm2, %v1661_v61 }
 0x26c   : > { %v1424_v27 = vpop.permute.xlu0 %1423 }
 0x26d   : > { %1427 = vst.msk [vmem:[%s3112_s6] sm:$0xff] %vm1426_vm3, %v1424_v27 }
 0x270   : > { %v1695_v35 = vpop.permute.xlu1 %1694 }
 0x271   : > { %1697 = vst.msk [vmem:[%s3112_s6 + $0x8] sm:$0xff] %vm1426_vm3, %v1695_v35 }
 0x274   : > { %v1698_v60 = vld [vmem:[%s3112_s6] sm:$0xff] }
 0x275   : > { %v1705_v42 = vmul.f32 %v1698_v60, %v1698_v60 }
 0x278   : > { %v1699_v28 = vld [vmem:[%s3112_s6 + $0x8] sm:$0xff] }
 0x279   : > { %v1700_v14 = vadd.f32 %v1699_v28, %v1698_v60  ;;  %v1706_v16 = vmul.f32 %v1699_v28, %v1699_v28 }
 0x27b   : > { %1701 = vadd.xlane.f32.xlu0 %v1700_v14  ;;  %v1707_v31 = vadd.f32 %v1706_v16, %v1705_v42 }
 0x27d   : > { %1708 = vadd.xlane.f32.xlu1 %v1707_v31 }
 0x304   : > { %v1702_v62 = vpop.xlane.xlu0 %1701 }
 0x305   : > { %1704 = vst.msk [vmem:[%s255_s12] sm:$0xff] %vm1703_vm4, %v1702_v62 }
 0x306   : > { %v1709_v21 = vpop.xlane.xlu1 %1708 }
 0x307   : > { %1711 = vst.msk [vmem:[%s255_s12] sm:$0xff] %vm1710_vm5, %v1709_v21 }
 0x308 PF: > { %s3191_s13 = sld [smem:[#allocation13_spill]]  ;;  %p17_p10 = scmp.ge.s32.totalorder %s2155_s20, 4  }
 0x309   : > { %s3192_s17 = sld [smem:[#allocation14_spill]]  ;;  %s3193_s15 = smov %s2082_s16 }
 0x30a   : > { %s3195_s18 = smov %s2155_s20  ;;  %19 = sbr.rel (!%p17_p10) target bundleno = 9 (0x9), region = 103 }
 0x30e   : > { %s3194_s16 = smov %s3191_s13 }
 0x30f   :  { %1747 = vsyncpa [#allocation5], 1 }
 0x310   :  { %1749 = vsyncpa [#allocation5 + $0x1], 1 }
 0x311   :  { %1750 = vsyncpa [#allocation6], 1 }
 0x312   :  { %1752 = vsyncpa [#allocation6 + $0x1], 1 }
 0x313   :  { %1753 = vsyncpa [#allocation8], 1 }

</bundles_post_ra>
